<compile_context>
chip_gen: v7x
topology: tpu7x:2x2x1
jax: 0.10.0
libtpu: 0.0.40
codegen_flags: <defaults>
</compile_context>

<pallas_src>
import functools

import jax
import jax.numpy as jnp
from jax.experimental import pallas as pl
from jax.experimental.pallas import tpu as pltpu


def _conv_bn_relu_kernel(x_ref, w_ref, bias_ref, o_ref, *,
                         kh_size, kw_size, apply_relu):
    """One (batch, Cout-tile, H-tile) grid step.

    x_ref:    (1, Hp, Wp, Cin)       whole padded image (VMEM resident per batch)
    w_ref:    (KH*KW, Cin, TCO)      per-tap weights, BN scale already folded in
    bias_ref: (1, TCO) f32           folded BN bias (beta - mean*scale)
    o_ref:    (1, TH, out_w, TCO)
    """
    th = o_ref.shape[1]
    out_w = o_ref.shape[2]
    tco = o_ref.shape[3]
    cin = x_ref.shape[3]
    m = th * out_w

    # grid = (N, n_co, n_h): H-tile axis is innermost.
    h0 = pl.multiple_of(pl.program_id(2) * th, th)

    # Per-tap accumulation: slice the shifted window straight off the resident
    # image and feed it to the MXU; accumulate in f32.
    acc = jnp.zeros((m, tco), jnp.float32)
    for kh in range(kh_size):
        for kw in range(kw_size):
            win = x_ref[0, pl.ds(h0 + kh, th), pl.ds(kw, out_w), :]  # (TH, out_w, Cin)
            acc = acc + jnp.dot(win.reshape(m, cin),
                                w_ref[kh * kw_size + kw],
                                preferred_element_type=jnp.float32)

    # f32 epilogue: folded BN bias + optional ReLU.
    y = acc + bias_ref[...]
    if apply_relu:
        y = jnp.maximum(y, 0.0)
    o_ref[0] = y.reshape(th, out_w, tco).astype(o_ref.dtype)


def _largest_divisor_leq(n, cap):
    best = 1
    for d in range(1, min(n, cap) + 1):
        if n % d == 0:
            best = d
    return best


def _tpu_generation():
    try:
        kind = jax.devices()[0].device_kind.lower()
    except Exception:
        return 6
    for g in (7, 6, 5, 4, 3):
        if "v%d" % g in kind:
            return g
    return 6


def _vmem_capacity_bytes():
    try:
        return int(pltpu.get_tpu_info().vmem_capacity_bytes)
    except Exception:
        return 64 << 20  # conservative (v7x per-TC capacity)


def basic_conv_nhwc(x_nhwc, weight_oihw, gamma, beta, running_mean, running_var, *,
                    stride=1, padding=0, eps=1e-5, relu=True, bn=True,
                    compute_dtype=None, out_dtype=None):
    """Fused Conv2d(bias=False) + BatchNorm2d(eval) + ReLU, NHWC-native."""
    # TODO(synk): only stride=1, dilation=1, groups=1 are implemented (the
    # BasicConv defaults in OSA); other configs need strided/grouped index maps.
    assert stride == 1

    N, H, W, Cin = x_nhwc.shape
    Cout, Cin_w, KH, KW = weight_oihw.shape
    assert Cin_w == Cin

    cdt = compute_dtype if compute_dtype is not None else x_nhwc.dtype
    odt = out_dtype if out_dtype is not None else x_nhwc.dtype

    out_h = H + 2 * padding - KH + 1
    out_w = W + 2 * padding - KW + 1
    # Sublane-align the output width so in-kernel reshapes / stores are
    # relayout-free; extra columns are computed on zero padding and sliced off.
    out_w_p = ((out_w + 7) // 8) * 8
    extra_w = out_w_p - out_w

    # TODO(synk): padding is still an XLA pre-pass (one extra HBM round trip of x);
    # could move in-kernel with masked edge reads for another ~1.3x on input bytes.
    x = jnp.pad(x_nhwc.astype(cdt),
                ((0, 0), (padding, padding), (padding, padding + extra_w), (0, 0)))
    Hp = H + 2 * padding
    Wp = W + 2 * padding + extra_w

    # Fold BN (inference) scale into the weights in f32, then cast.
    w_f32 = jnp.transpose(weight_oihw, (2, 3, 1, 0)).astype(jnp.float32)  # (KH,KW,Cin,Cout)
    if bn:
        scale = (gamma.astype(jnp.float32)
                 / jnp.sqrt(running_var.astype(jnp.float32) + eps))
        bias = beta.astype(jnp.float32) - running_mean.astype(jnp.float32) * scale
        w_f32 = w_f32 * scale[None, None, None, :]
    else:
        bias = jnp.zeros((Cout,), jnp.float32)
    w = w_f32.reshape(KH * KW, Cin, Cout).astype(cdt)
    bias = bias.reshape(1, Cout).astype(jnp.float32)

    # --- Generation-aware tiling --------------------------------------------
    gen = _tpu_generation()
    if gen >= 6 and Cout % 256 == 0:
        tco = 256                      # v6e/v7x MXU is 2x(256x256): use full N width
    elif Cout % 128 == 0:
        tco = 128                      # v5e MXU is 128-wide; also fallback
    else:
        tco = Cout                     # small Cout: full extent (satisfies (8,128) rule)
    n_co = Cout // tco

    # M tile: up to ~512 output pixels; th must divide out_h (keeps the dynamic
    # H slice in bounds without masking).
    # TODO(synk): masked remainder tiles would allow non-divisor th for odd out_h.
    target_m = 512
    th = _largest_divisor_leq(out_h, max(1, target_m // out_w_p))
    n_h = out_h // th
    # Keep >=2 tiles on a parallel axis so both TensorCores get work at N=1.
    if N == 1 and n_co == 1 and n_h == 1 and out_h > 1:
        th = _largest_divisor_leq(out_h, max(1, out_h // 2))
        n_h = out_h // th

    isz = jnp.dtype(cdt).itemsize
    osz = jnp.dtype(odt).itemsize
    img_bytes = Hp * Wp * Cin * isz

    # v7x has only 64 MiB VMEM/TC: single-buffer the resident image when large
    # (its block index only changes per batch element, so overlap loss is tiny).
    img_bufs = 2
    x_spec_kwargs = {}
    if gen >= 7 and img_bytes > (2 << 20):
        x_spec_kwargs["pipeline_mode"] = pl.Buffered(1)
        img_bufs = 1

    vmem_cap = _vmem_capacity_bytes()
    budget = int(vmem_cap * 0.75)

    def footprint(th_, tco_):
        m = th_ * out_w_p
        return (img_bufs * img_bytes                    # resident padded image
                + 2 * KH * KW * Cin * tco_ * isz        # weight block (double-buffered)
                + 2 * tco_ * 4                          # bias block
                + 2 * m * tco_ * osz                    # output block (double-buffered)
                + m * (Cin * isz + tco_ * 4)            # live window + f32 accumulator
                + (4 << 20))                            # slack

    if footprint(th, tco) > budget and tco > 128 and Cout % 128 == 0:
        tco = 128
        n_co = Cout // tco
    while footprint(th, tco) > budget and th > 1:
        th = _largest_divisor_leq(out_h, max(1, th // 2))
        n_h = out_h // th

    vmem_limit = int(min(max(footprint(th, tco), 16 << 20), budget))

    kernel = functools.partial(_conv_bn_relu_kernel,
                               kh_size=KH, kw_size=KW, apply_relu=relu)

    out = pl.pallas_call(
        kernel,
        out_shape=jax.ShapeDtypeStruct((N, out_h, out_w_p, Cout), odt),
        # H-tile axis innermost: weight/bias block index is constant over it, so
        # the weight is DMA'd once per (n, co) instead of once per grid step; the
        # padded image block index is constant over both inner axes (resident).
        grid=(N, n_co, n_h),
        in_specs=[
            pl.BlockSpec((1, Hp, Wp, Cin), lambda n, c, h: (n, 0, 0, 0),
                         **x_spec_kwargs),
            pl.BlockSpec((KH * KW, Cin, tco), lambda n, c, h: (0, 0, c)),
            pl.BlockSpec((1, tco), lambda n, c, h: (0, c)),
        ],
        out_specs=pl.BlockSpec((1, th, out_w_p, tco), lambda n, c, h: (n, h, 0, c)),
        compiler_params=pltpu.CompilerParams(
            dimension_semantics=("parallel", "parallel", "parallel"),
            vmem_limit_bytes=vmem_limit),
    )(x, w, bias)

    if extra_w:
        out = out[:, :, :out_w, :]
    return out


def basic_conv(x_nchw, weight_oihw, gamma, beta, running_mean, running_var, *,
               stride=1, padding=0, eps=1e-5, relu=True, bn=True,
               compute_dtype=None, out_dtype=None):
    """PyTorch-layout (NCHW / OIHW) wrapper.

    For best performance keep the model NHWC end-to-end and call
    `basic_conv_nhwc` directly; the two transposes here are extra HBM passes
    kept only for drop-in PyTorch parity.
    """
    x = jnp.transpose(x_nchw, (0, 2, 3, 1))
    out = basic_conv_nhwc(x, weight_oihw, gamma, beta, running_mean, running_var,
                          stride=stride, padding=padding, eps=eps,
                          relu=relu, bn=bn,
                          compute_dtype=compute_dtype, out_dtype=out_dtype)
    return jnp.transpose(out, (0, 3, 1, 2))


if __name__ == "__main__":
    # BasicConv(in_planes=4, out_planes=8, kernel_size=3, stride=1, padding=1)
    N, Cin, H, W = 2, 4, 16, 16
    Cout, Kk, pad = 8, 3, 1

    key = jax.random.PRNGKey(0)
    kx, kw_, kg, kb, km, kv = jax.random.split(key, 6)

    x = jax.random.normal(kx, (N, Cin, H, W), dtype=jnp.float32)
    weight = jax.random.normal(kw_, (Cout, Cin, Kk, Kk), dtype=jnp.float32) * 0.1
    gamma = 1.0 + 0.1 * jax.random.normal(kg, (Cout,), dtype=jnp.float32)
    beta = 0.1 * jax.random.normal(kb, (Cout,), dtype=jnp.float32)
    running_mean = 0.1 * jax.random.normal(km, (Cout,), dtype=jnp.float32)
    running_var = jnp.abs(1.0 + 0.1 * jax.random.normal(kv, (Cout,), dtype=jnp.float32))

    def ref_forward(x32, w32, cast=None):
        s = gamma / jnp.sqrt(running_var + 1e-5)
        b = beta - running_mean * s
        w_fold = w32 * s[:, None, None, None]
        xr, wr = x32, w_fold
        if cast is not None:
            xr = xr.astype(cast).astype(jnp.float32)
            wr = wr.astype(cast).astype(jnp.float32)
        y = jax.lax.conv_general_dilated(
            xr, wr, window_strides=(1, 1), padding=((pad, pad), (pad, pad)),
            dimension_numbers=("NCHW", "OIHW", "NCHW"),
            precision=jax.lax.Precision.HIGHEST)
        y = y + b[None, :, None, None]
        return jnp.maximum(y, 0.0)

    # f32 path: check against the XLA conv reference (same BN fold / ReLU).
    out_f32 = basic_conv(x, weight, gamma, beta, running_mean, running_var,
                         stride=1, padding=pad, relu=True, bn=True)
    out_f32 = jax.block_until_ready(out_f32)
    ref_f32 = ref_forward(x, weight)
    assert out_f32.shape == (N, Cout, H, W)
    assert jnp.allclose(out_f32, ref_f32, atol=2e-3, rtol=2e-3)

    # bf16 compute path (f32 accumulation + f32 epilogue): reference built from
    # bf16-rounded activations / folded weights, so only accumulation order differs.
    out_bf16 = basic_conv(x, weight, gamma, beta, running_mean, running_var,
                          stride=1, padding=pad, relu=True, bn=True,
                          compute_dtype=jnp.bfloat16, out_dtype=jnp.float32)
    out_bf16 = jax.block_until_ready(out_bf16)
    ref_bf16 = ref_forward(x, weight, cast=jnp.bfloat16)
    assert out_bf16.shape == (N, Cout, H, W)
    assert jnp.allclose(out_bf16, ref_bf16, atol=2e-2, rtol=2e-2)

    print("KERNEL_OK")
</pallas_src>

<mosaic_0001>
module attributes {stable_mosaic.version = 11 : i64} {
  func.func @_conv_bn_relu_kernel(%arg0: i32, %arg1: i32, %arg2: i32, %arg3: memref<1x18x18x4xf32, #tpu.memory_space<vmem>>, %arg4: memref<9x4x8xf32, #tpu.memory_space<vmem>>, %arg5: memref<1x8xf32, #tpu.memory_space<vmem>>, %arg6: memref<1x16x16x8xf32, #tpu.memory_space<vmem>>) attributes {dimension_semantics = [#tpu.dimension_semantics<parallel>, #tpu.dimension_semantics<parallel>, #tpu.dimension_semantics<parallel>], iteration_bounds = array<i64: 2, 1, 1>, scalar_prefetch = 0 : i64, scratch_operands = 0 : i64, tpu.core_type = #tpu.core_type<tc>, window_params = [{transform_indices = @transform_0, window_bounds = array<i64: 1, 18, 18, 4>}, {transform_indices = @transform_1, window_bounds = array<i64: 9, 4, 8>}, {transform_indices = @transform_2, window_bounds = array<i64: 1, 8>}, {transform_indices = @transform_3, window_bounds = array<i64: 1, 16, 16, 8>}]} {
    %c16_i32 = arith.constant 16 : i32
    %0 = arith.muli %arg2, %c16_i32 : i32
    %1 = tpu.assume_multiple %0, 16 : i32
    %cst = arith.constant 0.000000e+00 : f32
    %2 = vector.broadcast %cst : f32 to vector<256x8xf32>
    %c0_i32 = arith.constant 0 : i32
    %3 = arith.addi %1, %c0_i32 : i32
    %c0 = arith.constant 0 : index
    %4 = arith.index_cast %3 : i32 to index
    %c0_0 = arith.constant 0 : index
    %c0_1 = arith.constant 0 : index
    %5 = vector.load %arg3[%c0, %4, %c0_0, %c0_1] : memref<1x18x18x4xf32, #tpu.memory_space<vmem>>, vector<1x16x16x4xf32>
    %6 = vector.shape_cast %5 : vector<1x16x16x4xf32> to vector<16x16x4xf32>
    %7 = vector.shape_cast %6 : vector<16x16x4xf32> to vector<256x4xf32>
    %c0_2 = arith.constant 0 : index
    %c0_3 = arith.constant 0 : index
    %c0_4 = arith.constant 0 : index
    %8 = vector.load %arg4[%c0_2, %c0_3, %c0_4] : memref<9x4x8xf32, #tpu.memory_space<vmem>>, vector<1x4x8xf32>
    %9 = vector.shape_cast %8 : vector<1x4x8xf32> to vector<4x8xf32>
    %cst_5 = arith.constant dense<0.000000e+00> : vector<256x8xf32>
    %10 = tpu.matmul %7, %9, %cst_5 {dimension_numbers = #tpu.dot_dimension_numbers<[1], [0], [0], [1], [0, 0, 1, 1], [], []>} : vector<256x4xf32>, vector<4x8xf32>, vector<256x8xf32> -> vector<256x8xf32>
    %11 = arith.addf %2, %10 : vector<256x8xf32>
    %c0_i32_6 = arith.constant 0 : i32
    %12 = arith.addi %1, %c0_i32_6 : i32
    %c0_7 = arith.constant 0 : index
    %13 = arith.index_cast %12 : i32 to index
    %c1 = arith.constant 1 : index
    %c0_8 = arith.constant 0 : index
    %14 = vector.load %arg3[%c0_7, %13, %c1, %c0_8] : memref<1x18x18x4xf32, #tpu.memory_space<vmem>>, vector<1x16x16x4xf32>
    %15 = vector.shape_cast %14 : vector<1x16x16x4xf32> to vector<16x16x4xf32>
    %16 = vector.shape_cast %15 : vector<16x16x4xf32> to vector<256x4xf32>
    %c1_9 = arith.constant 1 : index
    %c0_10 = arith.constant 0 : index
    %c0_11 = arith.constant 0 : index
    %17 = vector.load %arg4[%c1_9, %c0_10, %c0_11] : memref<9x4x8xf32, #tpu.memory_space<vmem>>, vector<1x4x8xf32>
    %18 = vector.shape_cast %17 : vector<1x4x8xf32> to vector<4x8xf32>
    %cst_12 = arith.constant dense<0.000000e+00> : vector<256x8xf32>
    %19 = tpu.matmul %16, %18, %cst_12 {dimension_numbers = #tpu.dot_dimension_numbers<[1], [0], [0], [1], [0, 0, 1, 1], [], []>} : vector<256x4xf32>, vector<4x8xf32>, vector<256x8xf32> -> vector<256x8xf32>
    %20 = arith.addf %11, %19 : vector<256x8xf32>
    %c0_i32_13 = arith.constant 0 : i32
    %21 = arith.addi %1, %c0_i32_13 : i32
    %c0_14 = arith.constant 0 : index
    %22 = arith.index_cast %21 : i32 to index
    %c2 = arith.constant 2 : index
    %c0_15 = arith.constant 0 : index
    %23 = vector.load %arg3[%c0_14, %22, %c2, %c0_15] : memref<1x18x18x4xf32, #tpu.memory_space<vmem>>, vector<1x16x16x4xf32>
    %24 = vector.shape_cast %23 : vector<1x16x16x4xf32> to vector<16x16x4xf32>
    %25 = vector.shape_cast %24 : vector<16x16x4xf32> to vector<256x4xf32>
    %c2_16 = arith.constant 2 : index
    %c0_17 = arith.constant 0 : index
    %c0_18 = arith.constant 0 : index
    %26 = vector.load %arg4[%c2_16, %c0_17, %c0_18] : memref<9x4x8xf32, #tpu.memory_space<vmem>>, vector<1x4x8xf32>
    %27 = vector.shape_cast %26 : vector<1x4x8xf32> to vector<4x8xf32>
    %cst_19 = arith.constant dense<0.000000e+00> : vector<256x8xf32>
    %28 = tpu.matmul %25, %27, %cst_19 {dimension_numbers = #tpu.dot_dimension_numbers<[1], [0], [0], [1], [0, 0, 1, 1], [], []>} : vector<256x4xf32>, vector<4x8xf32>, vector<256x8xf32> -> vector<256x8xf32>
    %29 = arith.addf %20, %28 : vector<256x8xf32>
    %c1_i32 = arith.constant 1 : i32
    %30 = arith.addi %1, %c1_i32 : i32
    %c0_20 = arith.constant 0 : index
    %31 = arith.index_cast %30 : i32 to index
    %c0_21 = arith.constant 0 : index
    %c0_22 = arith.constant 0 : index
    %32 = vector.load %arg3[%c0_20, %31, %c0_21, %c0_22] : memref<1x18x18x4xf32, #tpu.memory_space<vmem>>, vector<1x16x16x4xf32>
    %33 = vector.shape_cast %32 : vector<1x16x16x4xf32> to vector<16x16x4xf32>
    %34 = vector.shape_cast %33 : vector<16x16x4xf32> to vector<256x4xf32>
    %c3 = arith.constant 3 : index
    %c0_23 = arith.constant 0 : index
    %c0_24 = arith.constant 0 : index
    %35 = vector.load %arg4[%c3, %c0_23, %c0_24] : memref<9x4x8xf32, #tpu.memory_space<vmem>>, vector<1x4x8xf32>
    %36 = vector.shape_cast %35 : vector<1x4x8xf32> to vector<4x8xf32>
    %cst_25 = arith.constant dense<0.000000e+00> : vector<256x8xf32>
    %37 = tpu.matmul %34, %36, %cst_25 {dimension_numbers = #tpu.dot_dimension_numbers<[1], [0], [0], [1], [0, 0, 1, 1], [], []>} : vector<256x4xf32>, vector<4x8xf32>, vector<256x8xf32> -> vector<256x8xf32>
    %38 = arith.addf %29, %37 : vector<256x8xf32>
    %c1_i32_26 = arith.constant 1 : i32
    %39 = arith.addi %1, %c1_i32_26 : i32
    %c0_27 = arith.constant 0 : index
    %40 = arith.index_cast %39 : i32 to index
    %c1_28 = arith.constant 1 : index
    %c0_29 = arith.constant 0 : index
    %41 = vector.load %arg3[%c0_27, %40, %c1_28, %c0_29] : memref<1x18x18x4xf32, #tpu.memory_space<vmem>>, vector<1x16x16x4xf32>
    %42 = vector.shape_cast %41 : vector<1x16x16x4xf32> to vector<16x16x4xf32>
    %43 = vector.shape_cast %42 : vector<16x16x4xf32> to vector<256x4xf32>
    %c4 = arith.constant 4 : index
    %c0_30 = arith.constant 0 : index
    %c0_31 = arith.constant 0 : index
    %44 = vector.load %arg4[%c4, %c0_30, %c0_31] : memref<9x4x8xf32, #tpu.memory_space<vmem>>, vector<1x4x8xf32>
    %45 = vector.shape_cast %44 : vector<1x4x8xf32> to vector<4x8xf32>
    %cst_32 = arith.constant dense<0.000000e+00> : vector<256x8xf32>
    %46 = tpu.matmul %43, %45, %cst_32 {dimension_numbers = #tpu.dot_dimension_numbers<[1], [0], [0], [1], [0, 0, 1, 1], [], []>} : vector<256x4xf32>, vector<4x8xf32>, vector<256x8xf32> -> vector<256x8xf32>
    %47 = arith.addf %38, %46 : vector<256x8xf32>
    %c1_i32_33 = arith.constant 1 : i32
    %48 = arith.addi %1, %c1_i32_33 : i32
    %c0_34 = arith.constant 0 : index
    %49 = arith.index_cast %48 : i32 to index
    %c2_35 = arith.constant 2 : index
    %c0_36 = arith.constant 0 : index
    %50 = vector.load %arg3[%c0_34, %49, %c2_35, %c0_36] : memref<1x18x18x4xf32, #tpu.memory_space<vmem>>, vector<1x16x16x4xf32>
    %51 = vector.shape_cast %50 : vector<1x16x16x4xf32> to vector<16x16x4xf32>
    %52 = vector.shape_cast %51 : vector<16x16x4xf32> to vector<256x4xf32>
    %c5 = arith.constant 5 : index
    %c0_37 = arith.constant 0 : index
    %c0_38 = arith.constant 0 : index
    %53 = vector.load %arg4[%c5, %c0_37, %c0_38] : memref<9x4x8xf32, #tpu.memory_space<vmem>>, vector<1x4x8xf32>
    %54 = vector.shape_cast %53 : vector<1x4x8xf32> to vector<4x8xf32>
    %cst_39 = arith.constant dense<0.000000e+00> : vector<256x8xf32>
    %55 = tpu.matmul %52, %54, %cst_39 {dimension_numbers = #tpu.dot_dimension_numbers<[1], [0], [0], [1], [0, 0, 1, 1], [], []>} : vector<256x4xf32>, vector<4x8xf32>, vector<256x8xf32> -> vector<256x8xf32>
    %56 = arith.addf %47, %55 : vector<256x8xf32>
    %c2_i32 = arith.constant 2 : i32
    %57 = arith.addi %1, %c2_i32 : i32
    %c0_40 = arith.constant 0 : index
    %58 = arith.index_cast %57 : i32 to index
    %c0_41 = arith.constant 0 : index
    %c0_42 = arith.constant 0 : index
    %59 = vector.load %arg3[%c0_40, %58, %c0_41, %c0_42] : memref<1x18x18x4xf32, #tpu.memory_space<vmem>>, vector<1x16x16x4xf32>
    %60 = vector.shape_cast %59 : vector<1x16x16x4xf32> to vector<16x16x4xf32>
    %61 = vector.shape_cast %60 : vector<16x16x4xf32> to vector<256x4xf32>
    %c6 = arith.constant 6 : index
    %c0_43 = arith.constant 0 : index
    %c0_44 = arith.constant 0 : index
    %62 = vector.load %arg4[%c6, %c0_43, %c0_44] : memref<9x4x8xf32, #tpu.memory_space<vmem>>, vector<1x4x8xf32>
    %63 = vector.shape_cast %62 : vector<1x4x8xf32> to vector<4x8xf32>
    %cst_45 = arith.constant dense<0.000000e+00> : vector<256x8xf32>
    %64 = tpu.matmul %61, %63, %cst_45 {dimension_numbers = #tpu.dot_dimension_numbers<[1], [0], [0], [1], [0, 0, 1, 1], [], []>} : vector<256x4xf32>, vector<4x8xf32>, vector<256x8xf32> -> vector<256x8xf32>
    %65 = arith.addf %56, %64 : vector<256x8xf32>
    %c2_i32_46 = arith.constant 2 : i32
    %66 = arith.addi %1, %c2_i32_46 : i32
    %c0_47 = arith.constant 0 : index
    %67 = arith.index_cast %66 : i32 to index
    %c1_48 = arith.constant 1 : index
    %c0_49 = arith.constant 0 : index
    %68 = vector.load %arg3[%c0_47, %67, %c1_48, %c0_49] : memref<1x18x18x4xf32, #tpu.memory_space<vmem>>, vector<1x16x16x4xf32>
    %69 = vector.shape_cast %68 : vector<1x16x16x4xf32> to vector<16x16x4xf32>
    %70 = vector.shape_cast %69 : vector<16x16x4xf32> to vector<256x4xf32>
    %c7 = arith.constant 7 : index
    %c0_50 = arith.constant 0 : index
    %c0_51 = arith.constant 0 : index
    %71 = vector.load %arg4[%c7, %c0_50, %c0_51] : memref<9x4x8xf32, #tpu.memory_space<vmem>>, vector<1x4x8xf32>
    %72 = vector.shape_cast %71 : vector<1x4x8xf32> to vector<4x8xf32>
    %cst_52 = arith.constant dense<0.000000e+00> : vector<256x8xf32>
    %73 = tpu.matmul %70, %72, %cst_52 {dimension_numbers = #tpu.dot_dimension_numbers<[1], [0], [0], [1], [0, 0, 1, 1], [], []>} : vector<256x4xf32>, vector<4x8xf32>, vector<256x8xf32> -> vector<256x8xf32>
    %74 = arith.addf %65, %73 : vector<256x8xf32>
    %c2_i32_53 = arith.constant 2 : i32
    %75 = arith.addi %1, %c2_i32_53 : i32
    %c0_54 = arith.constant 0 : index
    %76 = arith.index_cast %75 : i32 to index
    %c2_55 = arith.constant 2 : index
    %c0_56 = arith.constant 0 : index
    %77 = vector.load %arg3[%c0_54, %76, %c2_55, %c0_56] : memref<1x18x18x4xf32, #tpu.memory_space<vmem>>, vector<1x16x16x4xf32>
    %78 = vector.shape_cast %77 : vector<1x16x16x4xf32> to vector<16x16x4xf32>
    %79 = vector.shape_cast %78 : vector<16x16x4xf32> to vector<256x4xf32>
    %c8 = arith.constant 8 : index
    %c0_57 = arith.constant 0 : index
    %c0_58 = arith.constant 0 : index
    %80 = vector.load %arg4[%c8, %c0_57, %c0_58] : memref<9x4x8xf32, #tpu.memory_space<vmem>>, vector<1x4x8xf32>
    %81 = vector.shape_cast %80 : vector<1x4x8xf32> to vector<4x8xf32>
    %cst_59 = arith.constant dense<0.000000e+00> : vector<256x8xf32>
    %82 = tpu.matmul %79, %81, %cst_59 {dimension_numbers = #tpu.dot_dimension_numbers<[1], [0], [0], [1], [0, 0, 1, 1], [], []>} : vector<256x4xf32>, vector<4x8xf32>, vector<256x8xf32> -> vector<256x8xf32>
    %83 = arith.addf %74, %82 : vector<256x8xf32>
    %c0_60 = arith.constant 0 : index
    %c0_61 = arith.constant 0 : index
    %84 = vector.load %arg5[%c0_60, %c0_61] : memref<1x8xf32, #tpu.memory_space<vmem>>, vector<1x8xf32>
    %85 = vector.broadcast %84 : vector<1x8xf32> to vector<256x8xf32>
    %86 = arith.addf %83, %85 : vector<256x8xf32>
    %cst_62 = arith.constant 0.000000e+00 : f32
    %87 = vector.broadcast %cst_62 : f32 to vector<256x8xf32>
    %88 = arith.maximumf %86, %87 : vector<256x8xf32>
    %89 = vector.shape_cast %88 : vector<256x8xf32> to vector<16x16x8xf32>
    %c0_63 = arith.constant 0 : index
    %c0_64 = arith.constant 0 : index
    %c0_65 = arith.constant 0 : index
    %c0_66 = arith.constant 0 : index
    %90 = vector.load %arg6[%c0_63, %c0_64, %c0_65, %c0_66] : memref<1x16x16x8xf32, #tpu.memory_space<vmem>>, vector<1x16x16x8xf32>
    %91 = vector.shape_cast %90 : vector<1x16x16x8xf32> to vector<16x16x8xf32>
    %92 = vector.shape_cast %89 : vector<16x16x8xf32> to vector<1x16x16x8xf32>
    tpu.vector_store %arg6[%c0_63, %c0_64, %c0_65, %c0_66], %92 {strides = array<i32>} : memref<1x16x16x8xf32, #tpu.memory_space<vmem>>, vector<1x16x16x8xf32>,
    return
  }
  func.func @transform_0(%arg0: i32, %arg1: i32, %arg2: i32) -> (i32, i32, i32, i32) {
    %c0_i32 = arith.constant 0 : i32
    %c0_i32_0 = arith.constant 0 : i32
    %c0_i32_1 = arith.constant 0 : i32
    %c0_i32_2 = arith.constant 0 : i32
    return %arg0, %c0_i32, %c0_i32_0, %c0_i32_1 : i32, i32, i32, i32
  }
  func.func @transform_1(%arg0: i32, %arg1: i32, %arg2: i32) -> (i32, i32, i32) {
    %c0_i32 = arith.constant 0 : i32
    %c0_i32_0 = arith.constant 0 : i32
    %c0_i32_1 = arith.constant 0 : i32
    return %c0_i32, %c0_i32_0, %arg1 : i32, i32, i32
  }
  func.func @transform_2(%arg0: i32, %arg1: i32, %arg2: i32) -> (i32, i32) {
    %c0_i32 = arith.constant 0 : i32
    %c0_i32_0 = arith.constant 0 : i32
    return %c0_i32, %arg1 : i32, i32
  }
  func.func @transform_3(%arg0: i32, %arg1: i32, %arg2: i32) -> (i32, i32, i32, i32) {
    %c0_i32 = arith.constant 0 : i32
    %c0_i32_0 = arith.constant 0 : i32
    return %arg0, %arg2, %c0_i32, %arg1 : i32, i32, i32, i32
  }
}

</mosaic_0001>

<bundles_post_ra>
// kernel: tpu_custom_call.1
= control target key start
LH: loop header
LB: loop body
LE: loop exit
PB: predicated region body
PF: predicated region fallthrough
CT: control target
= control target key end

     0   :  { %s5524_s12 = smov 0   ;;  %s5526_s13 = smov 0   ;;  %s6603_s0 = inlined_call_operand.vmem [shape: f32[2,18,18,4], index: 0, kind: input, shape index: {}]   ;;  %s6604_s1 = inlined_call_operand.vmem [shape: f32[9,4,8], index: 1, kind: input, shape index: {}]   ;;  %s6605_s2 = inlined_call_operand.vmem [shape: f32[1,8], index: 2, kind: input, shape index: {}]   ;;  %s6606_s3 = inlined_call_operand.vmem [shape: f32[2,16,16,8], index: 3, kind: output, shape index: {}]  }
   0x1   :  { %s5528_s14 = smov 0  }
   0x2 LB: > { %s32_s15 = sadd.s32 1, %s5498_s13  ;;  %p3945_p0 = scmp.ge.s32.totalorder %s5502_s14, 1  ;;  %s5502_s14 = sphi %s5528_s14, %s13_s14   ;;  %s5498_s13 = sphi %s5526_s13, %s6717_s13   ;;  %s5494_s12 = sphi %s5524_s12, %s6716_s12  }
   0x3   : > { %p34_p1 = scmp.ge.s32.totalorder %s32_s15, 2  ;;  %p177_p2 = scmp.lt.s32.totalorder %s5502_s14, 3 }
   0x5   : > { %s6719_s15 = smov (%p34_p1, %s32_s15), 0  ;;  %p178_p3 = pnand %p3945_p0, %p177_p2 }
   0x7   : > { %181 = sbr.rel (%p178_p3) target bundleno = 526 (0x20e), region = 32 }
   0xe   : > { %v3949_v0 = vld [vmem:[%s6604_s1 + $0x4] sm:$0xf]  ;;  %vm409_vm0 = vcmask 1043456   ;;  %v5548_v1 = vld [vmem:[%s6604_s1 + $0x10] sm:$0xf]  ;;  %p216_p4 = scmp.lt.s32.totalorder %s5494_s12, 1 }
   0xf   : > { %4747 = vmatprep.subr.msk.mxu1 %vm409_vm0, %v3949_v0  ;;  %4947 = vmatprep.subr.msk.mxu0 %vm409_vm0, %v5548_v1  ;;  %v277_v2 = vld [vmem:[%s6604_s1] sm:$0xf]  ;;  %v4214_v3 = vld [vmem:[%s6604_s1 + $0x14] sm:$0xf]  ;;  %vm312_vm1 = vcmask 31744   ;;  %vm3769_vm2 = vcmask 64512  }
  0x10   : > { %4748 = vmatpush3.msk.msra.mxu1 %vm409_vm0, %v3949_v0  ;;  %4948 = vmatpush3.msk.msra.mxu0 %vm409_vm0, %v5548_v1  ;;  %s6721_s12 = smov (!%p216_p4, %s5494_s12), 1  ;;  %v4280_v9 = vld [vmem:[%s6604_s1 + $0x18] sm:$0xf]  ;;  %v5589_v10 = vld [vmem:[%s6604_s1 + $0x8] sm:$0xf] }
  0x11   : > { %4797 = vmatprep.subr.msk.mxu1 %vm409_vm0, %v277_v2  ;;  %4997 = vmatprep.subr.msk.mxu0 %vm409_vm0, %v4214_v3  ;;  %s5455_s24 = smul.u32 432, %s6721_s12  ;;  %v5708_v28 = vld [vmem:[%s6604_s1 + $0x1c] sm:$0xf]  ;;  %v5871_v61 = vld [vmem:[%s6604_s1 + $0xc] sm:$0xf]  ;;  %s4449_s17 = sshll.u32 %s6721_s12, 8 }
  0x12   : > { %s6493_s20 = scalar_lea.vmem %s6606_s3, %s4449_s17 }
  0x13   : > { %s5570_s27 = scalar_lea.vmem %s6603_s0, %s5455_s24 }
  0x14   : > { %v278_v4 = vld [vmem:[%s5570_s27 + $0x1] sm:$0xff]  ;;  %v4116_v5 = vld [vmem:[%s5570_s27 + $0x19] sm:$0xff]  ;;  %v279_v6 = vld [vmem:[%s5570_s27 + $0x9] sm:$0xff] }
  0x15   : > { %4749 = vmatprep.mubr.msk.f32.mxu1 %vm312_vm1, %v278_v4  ;;  %4949 = vmatprep.mubr.msk.f32.mxu0 %vm312_vm1, %v4116_v5  ;;  %v4117_v7 = vld [vmem:[%s5570_s27 + $0x21] sm:$0xff]  ;;  %v5579_v8 = vld [vmem:[%s5570_s27 + $0x31] sm:$0xff]  ;;  %v5594_v11 = vld [vmem:[%s5570_s27 + $0x39] sm:$0xff] }
  0x16   : > { %4750 = vmatmul.mubr.msk.f32.vlgmr.msra.gmra.mrb[0].mxu1 %vm312_vm1, %v279_v6  ;;  %4950 = vmatmul.mubr.msk.f32.vlgmr.msra.gmra.mrb[0].mxu0 %vm312_vm1, %v4117_v7  ;;  %v5600_v12 = vld [vmem:[%s5570_s27 + $0x49] sm:$0xff]  ;;  %v5613_v13 = vld [vmem:[%s5570_s27 + $0x51] sm:$0xff]  ;;  %v5616_v14 = vld [vmem:[%s5570_s27 + $0x61] sm:$0xff] }
  0x17   : > { %4798 = vmatpush3.msk.msra.mxu1 %vm409_vm0, %v277_v2  ;;  %4998 = vmatpush3.msk.msra.mxu0 %vm409_vm0, %v4214_v3  ;;  %v5627_v15 = vld [vmem:[%s5570_s27 + $0x69] sm:$0xff]  ;;  %v5630_v16 = vld [vmem:[%s5570_s27 + $0x79] sm:$0xff]  ;;  %v5641_v17 = vld [vmem:[%s5570_s27 + $0x81] sm:$0xff] }
  0x18   : > { %4752 = vmatprep.mubr.msk.f32.mxu1 %vm312_vm1, %v4116_v5  ;;  %4952 = vmatprep.mubr.msk.f32.mxu0 %vm312_vm1, %v5579_v8  ;;  %v5644_v18 = vld [vmem:[%s5570_s27 + $0x91] sm:$0xff]  ;;  %v5655_v19 = vld [vmem:[%s5570_s27 + $0x99] sm:$0xff]  ;;  %v5658_v20 = vld [vmem:[%s5570_s27 + $0xa9] sm:$0xff] }
  0x19   : > { %5047 = vmatprep.subr.msk.mxu0 %vm409_vm0, %v4280_v9  ;;  %4847 = vmatprep.subr.msk.mxu1 %vm409_vm0, %v5589_v10  ;;  %v5669_v21 = vld [vmem:[%s5570_s27 + $0xb1] sm:$0xff]  ;;  %v5672_v22 = vld [vmem:[%s5570_s27 + $0xc1] sm:$0xff]  ;;  %v5683_v23 = vld [vmem:[%s5570_s27 + $0xc9] sm:$0xff] }
  0x1a   : > { %4753 = vmatmul.mubr.msk.f32.gmra.mrb[2].mxu1 %vm312_vm1, %v4117_v7  ;;  %4953 = vmatmul.mubr.msk.f32.gmra.mrb[2].mxu0 %vm312_vm1, %v5594_v11  ;;  %v5686_v24 = vld [vmem:[%s5570_s27 + $0x1a] sm:$0xff]  ;;  %v5697_v25 = vld [vmem:[%s5570_s27 + $0x22] sm:$0xff]  ;;  %v5703_v27 = vld [vmem:[%s5570_s27 + $0x32] sm:$0xff] }
  0x1b   : > { %4755 = vmatprep.mubr.msk.f32.mxu1 %vm312_vm1, %v5579_v8  ;;  %4955 = vmatprep.mubr.msk.f32.mxu0 %vm312_vm1, %v5600_v12  ;;  %v5700_v26 = vld [vmem:[%s5570_s27 + $0xd9] sm:$0xff]  ;;  %v5718_v29 = vld [vmem:[%s5570_s27 + $0xe1] sm:$0xff]  ;;  %v5726_v31 = vld [vmem:[%s5570_s27 + $0xf1] sm:$0xff] }
  0x1c   : > { %6652 = vst [vmem:[#allocation2_spill] sm:$0xff] %v5718_v29  ;;  %v5721_v30 = vld [vmem:[%s5570_s27 + $0x3a] sm:$0xff]  ;;  %6653 = vst [vmem:[#allocation3_spill] sm:$0xff] %v5726_v31  ;;  %v5729_v32 = vld [vmem:[%s5570_s27 + $0x4a] sm:$0xff] }
  0x1d   : > { %v5742_v33 = vld [vmem:[%s5570_s27 + $0xf9] sm:$0xff]  ;;  %v5748_v35 = vld [vmem:[%s5570_s27 + $0x109] sm:$0xff]  ;;  %v5762_v37 = vld [vmem:[%s5570_s27 + $0x111] sm:$0xff] }
  0x1e   : > { %4756 = vmatmul.mubr.msk.f32.gmra.mrb[4].mxu1 %vm312_vm1, %v5594_v11  ;;  %4956 = vmatmul.mubr.msk.f32.gmra.mrb[4].mxu0 %vm312_vm1, %v5613_v13  ;;  %6654 = vst [vmem:[#allocation4_spill] sm:$0xff] %v5742_v33  ;;  %v5745_v34 = vld [vmem:[%s5570_s27 + $0x52] sm:$0xff]  ;;  %6655 = vst [vmem:[#allocation5_spill] sm:$0xff] %v5748_v35  ;;  %v5751_v36 = vld [vmem:[%s5570_s27 + $0x62] sm:$0xff] }
  0x1f   : > { %4758 = vmatprep.mubr.msk.f32.mxu1 %vm312_vm1, %v5600_v12  ;;  %4958 = vmatprep.mubr.msk.f32.mxu0 %vm312_vm1, %v5616_v14  ;;  %6656 = vst [vmem:[#allocation6_spill] sm:$0xff] %v5762_v37  ;;  %v5765_v38 = vld [vmem:[%s5570_s27 + $0x6a] sm:$0xff]  ;;  %v5768_v39 = vld [vmem:[%s5570_s27 + $0x121] sm:$0xff]  ;;  %v5788_v43 = vld [vmem:[%s5570_s27 + $0x139] sm:$0xff] }
  0x20   : > { %6657 = vst [vmem:[#allocation7_spill] sm:$0xff] %v5768_v39  ;;  %v5771_v40 = vld [vmem:[%s5570_s27 + $0x7a] sm:$0xff]  ;;  %v5782_v41 = vld [vmem:[%s5570_s27 + $0x129] sm:$0xff]  ;;  %6659 = vst [vmem:[#allocation9_spill] sm:$0xff] %v5788_v43 }
  0x21   : > { %6658 = vst [vmem:[#allocation8_spill] sm:$0xff] %v5782_v41  ;;  %v5785_v42 = vld [vmem:[%s5570_s27 + $0x82] sm:$0xff]  ;;  %v5791_v44 = vld [vmem:[%s5570_s27 + $0x92] sm:$0xff]  ;;  %v5805_v46 = vld [vmem:[%s5570_s27 + $0x9a] sm:$0xff] }
  0x22   : > { %4759 = vmatmul.mubr.msk.f32.gmra.mrb[6].mxu1 %vm312_vm1, %v5613_v13  ;;  %4959 = vmatmul.mubr.msk.f32.gmra.mrb[6].mxu0 %vm312_vm1, %v5627_v15  ;;  %v5802_v45 = vld [vmem:[%s5570_s27 + $0x141] sm:$0xff]  ;;  %v5808_v47 = vld [vmem:[%s5570_s27 + $0x151] sm:$0xff]  ;;  %v5822_v49 = vld [vmem:[%s5570_s27 + $0x159] sm:$0xff] }
  0x23   : > { %4761 = vmatprep.mubr.msk.f32.mxu1 %vm312_vm1, %v5616_v14  ;;  %4961 = vmatprep.mubr.msk.f32.mxu0 %vm312_vm1, %v5630_v16  ;;  %6660 = vst [vmem:[#allocation10_spill] sm:$0xff] %v5802_v45  ;;  %6661 = vst [vmem:[#allocation11_spill] sm:$0xff] %v5808_v47  ;;  %v5811_v48 = vld [vmem:[%s5570_s27 + $0xaa] sm:$0xff]  ;;  %v5825_v50 = vld [vmem:[%s5570_s27 + $0xb2] sm:$0xff] }
  0x24   : > { %6662 = vst [vmem:[#allocation12_spill] sm:$0xff] %v5822_v49  ;;  %v5828_v51 = vld [vmem:[%s5570_s27 + $0x169] sm:$0xff]  ;;  %v5842_v53 = vld [vmem:[%s5570_s27 + $0x171] sm:$0xff]  ;;  %v245_v55 = vld [vmem:[%s5570_s27] sm:$0xff] }
  0x25   : > { %6663 = vst [vmem:[#allocation13_spill] sm:$0xff] %v5828_v51  ;;  %v5831_v52 = vld [vmem:[%s5570_s27 + $0xc2] sm:$0xff]  ;;  %6664 = vst [vmem:[#allocation14_spill] sm:$0xff] %v5842_v53  ;;  %v5845_v54 = vld [vmem:[%s5570_s27 + $0xca] sm:$0xff] }
  0x26   : > { %4762 = vmatmul.mubr.msk.f32.gmra.mrb[8].mxu1 %vm312_vm1, %v5627_v15  ;;  %4962 = vmatmul.mubr.msk.f32.gmra.mrb[8].mxu0 %vm312_vm1, %v5641_v17  ;;  %v5849_v56 = vld [vmem:[%s5570_s27 + $0xda] sm:$0xff]  ;;  %v246_v57 = vld [vmem:[%s5570_s27 + $0x8] sm:$0xff]  ;;  %v5866_v60 = vld [vmem:[%s5570_s27 + $0xf2] sm:$0xff] }
  0x27   : > { %4764 = vmatprep.mubr.msk.f32.mxu1 %vm312_vm1, %v5630_v16  ;;  %4964 = vmatprep.mubr.msk.f32.mxu0 %vm312_vm1, %v5644_v18  ;;  %v5860_v58 = vld [vmem:[%s5570_s27 + $0xe2] sm:$0xff]  ;;  %v5863_v59 = vld [vmem:[%s5570_s27 + $0x18] sm:$0xff]  ;;  %v5889_v0 = vld [vmem:[%s5570_s27 + $0x30] sm:$0xff] }
  0x28   : > { %6665 = vst [vmem:[#allocation15_spill] sm:$0xff] %v5863_v59  ;;  %v5881_v62 = vld [vmem:[%s5570_s27 + $0x20] sm:$0xff]  ;;  %6667 = vst [vmem:[#allocation17_spill] sm:$0xff] %v5889_v0  ;;  %v5892_v2 = vld [vmem:[%s5570_s27 + $0x10a] sm:$0xff] }
  0x29   : > { %6666 = vst [vmem:[#allocation16_spill] sm:$0xff] %v5881_v62  ;;  %v5884_v63 = vld [vmem:[%s5570_s27 + $0xfa] sm:$0xff]  ;;  %v5908_v4 = vld [vmem:[%s5570_s27 + $0x112] sm:$0xff]  ;;  %v5911_v5 = vld [vmem:[%s5570_s27 + $0x48] sm:$0xff] }
  0x2a   : > { %4765 = vmatmul.mubr.msk.f32.gmra.mrb[10].mxu1 %vm312_vm1, %v5641_v17  ;;  %4965 = vmatmul.mubr.msk.f32.gmra.mrb[10].mxu0 %vm312_vm1, %v5655_v19  ;;  %v5905_v3 = vld [vmem:[%s5570_s27 + $0x38] sm:$0xff]  ;;  %6669 = vst [vmem:[#allocation19_spill] sm:$0xff] %v5911_v5  ;;  %v5914_v6 = vld [vmem:[%s5570_s27 + $0x122] sm:$0xff]  ;;  %v5925_v7 = vld [vmem:[%s5570_s27 + $0x50] sm:$0xff] }
  0x2b   : > { %4767 = vmatprep.mubr.msk.f32.mxu1 %vm312_vm1, %v5644_v18  ;;  %4967 = vmatprep.mubr.msk.f32.mxu0 %vm312_vm1, %v5658_v20  ;;  %6668 = vst [vmem:[#allocation18_spill] sm:$0xff] %v5905_v3  ;;  %6670 = vst [vmem:[#allocation20_spill] sm:$0xff] %v5925_v7 }
  0x2e   : > { %4768 = vmatmul.mubr.msk.f32.gmra.mrb[12].mxu1 %vm312_vm1, %v5655_v19  ;;  %4968 = vmatmul.mubr.msk.f32.gmra.mrb[12].mxu0 %vm312_vm1, %v5669_v21 }
  0x2f   : > { %4770 = vmatprep.mubr.msk.f32.mxu1 %vm312_vm1, %v5658_v20  ;;  %4970 = vmatprep.mubr.msk.f32.mxu0 %vm312_vm1, %v5672_v22 }
  0x32   : > { %4771 = vmatmul.mubr.msk.f32.gmra.mrb[14].mxu1 %vm312_vm1, %v5669_v21  ;;  %4971 = vmatmul.mubr.msk.f32.gmra.mrb[14].mxu0 %vm312_vm1, %v5683_v23 }
  0x33   : > { %4773 = vmatprep.mubr.msk.f32.mxu1 %vm312_vm1, %v5672_v22  ;;  %4999 = vmatprep.mubr.msk.f32.mxu0 %vm312_vm1, %v5686_v24 }
  0x36   : > { %4774 = vmatmul.mubr.msk.f32.gmra.mrb[16].mxu1 %vm312_vm1, %v5683_v23  ;;  %5000 = vmatmul.mubr.msk.f32.vlgmr.msra.gmra.mrb[0].mxu0 %vm312_vm1, %v5697_v25 }
  0x37   : > { %5048 = vmatpush3.msk.msra.mxu0 %vm409_vm0, %v4280_v9  ;;  %4776 = vmatprep.mubr.msk.f32.mxu1 %vm312_vm1, %v5700_v26  ;;  %v5928_v9 = vld [vmem:[%s5570_s27 + $0x12a] sm:$0xff] }
  0x38   : > { %5002 = vmatprep.mubr.msk.f32.mxu0 %vm312_vm1, %v5703_v27  ;;  %5097 = vmatprep.subr.msk.mxu0 %vm409_vm0, %v5708_v28 }
  0x3a   : > { %4777 = vmatmul.mubr.msk.f32.gmra.mrb[18].mxu1 %vm312_vm1, %v5718_v29  ;;  %5003 = vmatmul.mubr.msk.f32.gmra.mrb[2].mxu0 %vm312_vm1, %v5721_v30  ;;  %v6025_v29 = vld [vmem:[%s5570_s27 + $0xd8] sm:$0xff] }
  0x3b   : > { %4779 = vmatprep.mubr.msk.f32.mxu1 %vm312_vm1, %v5726_v31  ;;  %5005 = vmatprep.mubr.msk.f32.mxu0 %vm312_vm1, %v5729_v32  ;;  %v6008_v31 = vld [vmem:[%s5570_s27 + $0x18a] sm:$0xff] }
  0x3c   : > { %6681 = vst [vmem:[#allocation31_spill] sm:$0xff] %v6008_v31 }
  0x3e   : > { %4780 = vmatmul.mubr.msk.f32.gmra.mrb[20].mxu1 %vm312_vm1, %v5742_v33  ;;  %5006 = vmatmul.mubr.msk.f32.gmra.mrb[4].mxu0 %vm312_vm1, %v5745_v34  ;;  %v5994_v33 = vld [vmem:[%s5570_s27 + $0x182] sm:$0xff] }
  0x3f   : > { %4782 = vmatprep.mubr.msk.f32.mxu1 %vm312_vm1, %v5748_v35  ;;  %5008 = vmatprep.mubr.msk.f32.mxu0 %vm312_vm1, %v5751_v36  ;;  %v5991_v35 = vld [vmem:[%s5570_s27 + $0xa8] sm:$0xff]  ;;  %6679 = vst [vmem:[#allocation29_spill] sm:$0xff] %v5994_v33 }
  0x40   : > { %6678 = vst [vmem:[#allocation28_spill] sm:$0xff] %v5991_v35 }
  0x42   : > { %4783 = vmatmul.mubr.msk.f32.gmra.mrb[22].mxu1 %vm312_vm1, %v5762_v37  ;;  %5009 = vmatmul.mubr.msk.f32.gmra.mrb[6].mxu0 %vm312_vm1, %v5765_v38  ;;  %v5988_v37 = vld [vmem:[%s5570_s27 + $0x172] sm:$0xff] }
  0x43   : > { %4785 = vmatprep.mubr.msk.f32.mxu1 %vm312_vm1, %v5768_v39  ;;  %5011 = vmatprep.mubr.msk.f32.mxu0 %vm312_vm1, %v5771_v40  ;;  %v5985_v39 = vld [vmem:[%s5570_s27 + $0x98] sm:$0xff]  ;;  %6677 = vst [vmem:[#allocation27_spill] sm:$0xff] %v5988_v37 }
  0x44   : > { %6676 = vst [vmem:[#allocation26_spill] sm:$0xff] %v5985_v39 }
  0x46   : > { %4786 = vmatmul.mubr.msk.f32.gmra.mrb[24].mxu1 %vm312_vm1, %v5782_v41  ;;  %5012 = vmatmul.mubr.msk.f32.gmra.mrb[8].mxu0 %vm312_vm1, %v5785_v42  ;;  %v5974_v41 = vld [vmem:[%s5570_s27 + $0x16a] sm:$0xff] }
  0x47   : > { %4788 = vmatprep.mubr.msk.f32.mxu1 %vm312_vm1, %v5788_v43  ;;  %5014 = vmatprep.mubr.msk.f32.mxu0 %vm312_vm1, %v5791_v44  ;;  %v5971_v43 = vld [vmem:[%s5570_s27 + $0x90] sm:$0xff] }
  0x48   : > { %6675 = vst [vmem:[#allocation25_spill] sm:$0xff] %v5971_v43 }
  0x4a   : > { %4789 = vmatmul.mubr.msk.f32.gmra.mrb[26].mxu1 %vm312_vm1, %v5802_v45  ;;  %5015 = vmatmul.mubr.msk.f32.gmra.mrb[10].mxu0 %vm312_vm1, %v5805_v46  ;;  %v5968_v45 = vld [vmem:[%s5570_s27 + $0x15a] sm:$0xff] }
  0x4b   : > { %4791 = vmatprep.mubr.msk.f32.mxu1 %vm312_vm1, %v5808_v47  ;;  %5017 = vmatprep.mubr.msk.f32.mxu0 %vm312_vm1, %v5811_v48  ;;  %v5965_v47 = vld [vmem:[%s5570_s27 + $0x80] sm:$0xff] }
  0x4c   : > { %6674 = vst [vmem:[#allocation24_spill] sm:$0xff] %v5965_v47 }
  0x4e   : > { %4792 = vmatmul.mubr.msk.f32.gmra.mrb[28].mxu1 %vm312_vm1, %v5822_v49  ;;  %5018 = vmatmul.mubr.msk.f32.gmra.mrb[12].mxu0 %vm312_vm1, %v5825_v50  ;;  %v5954_v49 = vld [vmem:[%s5570_s27 + $0x152] sm:$0xff] }
  0x4f   : > { %4794 = vmatprep.mubr.msk.f32.mxu1 %vm312_vm1, %v5828_v51  ;;  %5020 = vmatprep.mubr.msk.f32.mxu0 %vm312_vm1, %v5831_v52  ;;  %v5951_v51 = vld [vmem:[%s5570_s27 + $0x78] sm:$0xff] }
  0x50   : > { %6673 = vst [vmem:[#allocation23_spill] sm:$0xff] %v5951_v51 }
  0x52   : > { %4795 = vmatmul.mubr.msk.f32.gmra.mrb[30].mxu1 %vm312_vm1, %v5842_v53  ;;  %5021 = vmatmul.mubr.msk.f32.gmra.mrb[14].mxu0 %vm312_vm1, %v5845_v54  ;;  %v5948_v53 = vld [vmem:[%s5570_s27 + $0x142] sm:$0xff] }
  0x53   : > { %4799 = vmatprep.mubr.msk.f32.mxu1 %vm312_vm1, %v245_v55  ;;  %5023 = vmatprep.mubr.msk.f32.mxu0 %vm312_vm1, %v5849_v56  ;;  %v5934_v55 = vld [vmem:[%s5570_s27 + $0x13a] sm:$0xff] }
  0x56   : > { %4800 = vmatmul.mubr.msk.f32.vlgmr.msra.gmra.mrb[0].mxu1 %vm312_vm1, %v246_v57  ;;  %5024 = vmatmul.mubr.msk.f32.gmra.mrb[16].mxu0 %vm312_vm1, %v5860_v58  ;;  %v5945_v57 = vld [vmem:[%s5570_s27 + $0x68] sm:$0xff] }
  0x57   : > { %4848 = vmatpush3.msk.msra.mxu1 %vm409_vm0, %v5589_v10  ;;  %4802 = vmatprep.mubr.msk.f32.mxu1 %vm312_vm1, %v5863_v59  ;;  %v5931_v10 = vld [vmem:[%s5570_s27 + $0x60] sm:$0xff]  ;;  %6672 = vst [vmem:[#allocation22_spill] sm:$0xff] %v5945_v57 }
  0x58   : > { %5026 = vmatprep.mubr.msk.f32.mxu0 %vm312_vm1, %v5866_v60  ;;  %4897 = vmatprep.subr.msk.mxu1 %vm409_vm0, %v5871_v61  ;;  %6671 = vst [vmem:[#allocation21_spill] sm:$0xff] %v5931_v10  ;;  %v6011_v59 = vld [vmem:[%s5570_s27 + $0xc0] sm:$0xff] }
  0x5a   : > { %4803 = vmatmul.mubr.msk.f32.gmra.mrb[2].mxu1 %vm312_vm1, %v5881_v62  ;;  %5027 = vmatmul.mubr.msk.f32.gmra.mrb[18].mxu0 %vm312_vm1, %v5884_v63  ;;  %v6005_v62 = vld [vmem:[%s5570_s27 + $0xb0] sm:$0xff] }
  0x5b   : > { %4805 = vmatprep.mubr.msk.f32.mxu1 %vm312_vm1, %v5889_v0  ;;  %5029 = vmatprep.mubr.msk.f32.mxu0 %vm312_vm1, %v5892_v2  ;;  %6680 = vst [vmem:[#allocation30_spill] sm:$0xff] %v6005_v62 }
  0x5e   : > { %4806 = vmatmul.mubr.msk.f32.gmra.mrb[4].mxu1 %vm312_vm1, %v5905_v3  ;;  %5030 = vmatmul.mubr.msk.f32.gmra.mrb[20].mxu0 %vm312_vm1, %v5908_v4 }
  0x5f   : > { %4808 = vmatprep.mubr.msk.f32.mxu1 %vm312_vm1, %v5911_v5  ;;  %5032 = vmatprep.mubr.msk.f32.mxu0 %vm312_vm1, %v5914_v6 }
  0x62   : > { %4809 = vmatmul.mubr.msk.f32.gmra.mrb[6].mxu1 %vm312_vm1, %v5925_v7  ;;  %5033 = vmatmul.mubr.msk.f32.gmra.mrb[22].mxu0 %vm312_vm1, %v5928_v9 }
  0x63   : > { %4811 = vmatprep.mubr.msk.f32.mxu1 %vm312_vm1, %v5931_v10  ;;  %5035 = vmatprep.mubr.msk.f32.mxu0 %vm312_vm1, %v5934_v55 }
  0x66   : > { %4812 = vmatmul.mubr.msk.f32.gmra.mrb[8].mxu1 %vm312_vm1, %v5945_v57  ;;  %5036 = vmatmul.mubr.msk.f32.gmra.mrb[24].mxu0 %vm312_vm1, %v5948_v53 }
  0x67   : > { %4814 = vmatprep.mubr.msk.f32.mxu1 %vm312_vm1, %v5951_v51  ;;  %5038 = vmatprep.mubr.msk.f32.mxu0 %vm312_vm1, %v5954_v49 }
  0x6a   : > { %4815 = vmatmul.mubr.msk.f32.gmra.mrb[10].mxu1 %vm312_vm1, %v5965_v47  ;;  %5039 = vmatmul.mubr.msk.f32.gmra.mrb[26].mxu0 %vm312_vm1, %v5968_v45 }
  0x6b   : > { %4817 = vmatprep.mubr.msk.f32.mxu1 %vm312_vm1, %v5971_v43  ;;  %5041 = vmatprep.mubr.msk.f32.mxu0 %vm312_vm1, %v5974_v41 }
  0x6e   : > { %4818 = vmatmul.mubr.msk.f32.gmra.mrb[12].mxu1 %vm312_vm1, %v5985_v39  ;;  %5042 = vmatmul.mubr.msk.f32.gmra.mrb[28].mxu0 %vm312_vm1, %v5988_v37  ;;  %v6030_v37 = vld [vmem:[%s6604_s1 + $0x20] sm:$0xf] }
  0x6f   : > { %4820 = vmatprep.mubr.msk.f32.mxu1 %vm312_vm1, %v5991_v35  ;;  %5044 = vmatprep.mubr.msk.f32.mxu0 %vm312_vm1, %v5994_v33  ;;  %v6022_v33 = vld [vmem:[%s5570_s27 + $0xc8] sm:$0xff] }
  0x70   : > { %6682 = vst [vmem:[#allocation32_spill] sm:$0xff] %v6022_v33 }
  0x72   : > { %4821 = vmatmul.mubr.msk.f32.gmra.mrb[14].mxu1 %vm312_vm1, %v6005_v62  ;;  %5045 = vmatmul.mubr.msk.f32.gmra.mrb[30].mxu0 %vm312_vm1, %v6008_v31  ;;  %v6041_v31 = vld [vmem:[%s5570_s27 + $0xe0] sm:$0xff] }
  0x73   : > { %4823 = vmatprep.mubr.msk.f32.mxu1 %vm312_vm1, %v6011_v59  ;;  %5049 = vmatprep.mubr.msk.f32.mxu0 %vm312_vm1, %v5889_v0  ;;  %v6046_v0 = vld [vmem:[%s5570_s27 + $0xf0] sm:$0xff] }
  0x76   : > { %4824 = vmatmul.mubr.msk.f32.gmra.mrb[16].mxu1 %vm312_vm1, %v6022_v33  ;;  %5050 = vmatmul.mubr.msk.f32.vlgmr.msra.gmra.mrb[0].mxu0 %vm312_vm1, %v5905_v3  ;;  %v962_v3 = vld [vmem:[%s5570_s27 + $0x2] sm:$0xff] }
  0x77   : > { %5098 = vmatpush3.msk.msra.mxu0 %vm409_vm0, %v5708_v28  ;;  %4826 = vmatprep.mubr.msk.f32.mxu1 %vm312_vm1, %v6025_v29  ;;  %v6059_v28 = vld [vmem:[%s5570_s27 + $0xf8] sm:$0xff] }
  0x78   : > { %5052 = vmatprep.mubr.msk.f32.mxu0 %vm312_vm1, %v5911_v5  ;;  %5147 = vmatprep.subr.msk.mxu0 %vm409_vm0, %v6030_v37  ;;  %v6062_v5 = vld [vmem:[%s5570_s27 + $0x108] sm:$0xff] }
  0x7a   : > { %4827 = vmatmul.mubr.msk.f32.gmra.mrb[18].mxu1 %vm312_vm1, %v6041_v31  ;;  %5053 = vmatmul.mubr.msk.f32.gmra.mrb[2].mxu0 %vm312_vm1, %v5925_v7  ;;  %v6073_v7 = vld [vmem:[%s5570_s27 + $0x110] sm:$0xff] }
  0x7b   : > { %4829 = vmatprep.mubr.msk.f32.mxu1 %vm312_vm1, %v6046_v0  ;;  %5055 = vmatprep.mubr.msk.f32.mxu0 %vm312_vm1, %v5931_v10  ;;  %v6076_v10 = vld [vmem:[%s5570_s27 + $0x120] sm:$0xff] }
  0x7e   : > { %4830 = vmatmul.mubr.msk.f32.gmra.mrb[20].mxu1 %vm312_vm1, %v6059_v28  ;;  %5056 = vmatmul.mubr.msk.f32.gmra.mrb[4].mxu0 %vm312_vm1, %v5945_v57  ;;  %v6087_v57 = vld [vmem:[%s5570_s27 + $0x128] sm:$0xff] }
  0x7f   : > { %4832 = vmatprep.mubr.msk.f32.mxu1 %vm312_vm1, %v6062_v5  ;;  %5058 = vmatprep.mubr.msk.f32.mxu0 %vm312_vm1, %v5951_v51  ;;  %v6090_v51 = vld [vmem:[%s5570_s27 + $0x138] sm:$0xff] }
  0x82   : > { %4833 = vmatmul.mubr.msk.f32.gmra.mrb[22].mxu1 %vm312_vm1, %v6073_v7  ;;  %5059 = vmatmul.mubr.msk.f32.gmra.mrb[6].mxu0 %vm312_vm1, %v5965_v47  ;;  %v6101_v47 = vld [vmem:[%s5570_s27 + $0x140] sm:$0xff] }
  0x83   : > { %4835 = vmatprep.mubr.msk.f32.mxu1 %vm312_vm1, %v6076_v10  ;;  %5061 = vmatprep.mubr.msk.f32.mxu0 %vm312_vm1, %v5971_v43  ;;  %v6104_v43 = vld [vmem:[%s5570_s27 + $0x150] sm:$0xff] }
  0x86   : > { %4836 = vmatmul.mubr.msk.f32.gmra.mrb[24].mxu1 %vm312_vm1, %v6087_v57  ;;  %5062 = vmatmul.mubr.msk.f32.gmra.mrb[8].mxu0 %vm312_vm1, %v5985_v39  ;;  %v6115_v39 = vld [vmem:[%s5570_s27 + $0x158] sm:$0xff] }
  0x87   : > { %4838 = vmatprep.mubr.msk.f32.mxu1 %vm312_vm1, %v6090_v51  ;;  %5064 = vmatprep.mubr.msk.f32.mxu0 %vm312_vm1, %v5991_v35  ;;  %v6118_v35 = vld [vmem:[%s5570_s27 + $0x168] sm:$0xff] }
  0x8a   : > { %4839 = vmatmul.mubr.msk.f32.gmra.mrb[26].mxu1 %vm312_vm1, %v6101_v47  ;;  %5065 = vmatmul.mubr.msk.f32.gmra.mrb[10].mxu0 %vm312_vm1, %v6005_v62  ;;  %v6129_v62 = vld [vmem:[%s5570_s27 + $0x170] sm:$0xff] }
  0x8b   : > { %4841 = vmatprep.mubr.msk.f32.mxu1 %vm312_vm1, %v6104_v43  ;;  %5067 = vmatprep.mubr.msk.f32.mxu0 %vm312_vm1, %v6011_v59 }
  0x8e   : > { %4842 = vmatmul.mubr.msk.f32.gmra.mrb[28].mxu1 %vm312_vm1, %v6115_v39  ;;  %5068 = vmatmul.mubr.msk.f32.gmra.mrb[12].mxu0 %vm312_vm1, %v6022_v33  ;;  %v963_v33 = vld [vmem:[%s5570_s27 + $0xa] sm:$0xff] }
  0x8f   : > { %4844 = vmatprep.mubr.msk.f32.mxu1 %vm312_vm1, %v6118_v35  ;;  %5070 = vmatprep.mubr.msk.f32.mxu0 %vm312_vm1, %v6025_v29 }
  0x92   : > { %4845 = vmatmul.mubr.msk.f32.gmra.mrb[30].mxu1 %vm312_vm1, %v6129_v62  ;;  %5071 = vmatmul.mubr.msk.f32.gmra.mrb[14].mxu0 %vm312_vm1, %v6041_v31 }
  0x93   : > { %4849 = vmatprep.mubr.msk.f32.mxu1 %vm312_vm1, %v962_v3  ;;  %5073 = vmatprep.mubr.msk.f32.mxu0 %vm312_vm1, %v6046_v0  ;;  %v6699_v3 = vld [vmem:[#allocation22_spill] sm:$0xff] }
  0x96   : > { %4850 = vmatmul.mubr.msk.f32.vlgmr.msra.gmra.mrb[0].mxu1 %vm312_vm1, %v963_v33  ;;  %5074 = vmatmul.mubr.msk.f32.gmra.mrb[16].mxu0 %vm312_vm1, %v6059_v28  ;;  %v4278_v33 = vld [vmem:[%s5570_s27 + $0x198] sm:$0xff] }
  0x97   : > { %4898 = vmatpush3.msk.msra.mxu1 %vm409_vm0, %v5871_v61  ;;  %4852 = vmatprep.mubr.msk.f32.mxu1 %vm312_vm1, %v5686_v24  ;;  %v6184_v24 = vld [vmem:[%s5570_s27 + $0x180] sm:$0xff] }
  0x98   : > { %5076 = vmatprep.mubr.msk.f32.mxu0 %vm312_vm1, %v6062_v5  ;;  %5197 = vmatprep.subr.msk.mxu1 %vm409_vm0, %v5548_v1  ;;  %v4279_v61 = vld [vmem:[%s5570_s27 + $0x1a0] sm:$0xff] }
  0x9a   : > { %4853 = vmatmul.mubr.msk.f32.gmra.mrb[2].mxu1 %vm312_vm1, %v5697_v25  ;;  %5077 = vmatmul.mubr.msk.f32.gmra.mrb[18].mxu0 %vm312_vm1, %v6073_v7  ;;  %v6195_v25 = vld [vmem:[%s5570_s27 + $0x188] sm:$0xff] }
  0x9b   : > { %4855 = vmatprep.mubr.msk.f32.mxu1 %vm312_vm1, %v5703_v27  ;;  %5079 = vmatprep.mubr.msk.f32.mxu0 %vm312_vm1, %v6076_v10 }
  0x9e   : > { %4856 = vmatmul.mubr.msk.f32.gmra.mrb[4].mxu1 %vm312_vm1, %v5721_v30  ;;  %5080 = vmatmul.mubr.msk.f32.gmra.mrb[20].mxu0 %vm312_vm1, %v6087_v57 }
  0x9f   : > { %4858 = vmatprep.mubr.msk.f32.mxu1 %vm312_vm1, %v5729_v32  ;;  %5082 = vmatprep.mubr.msk.f32.mxu0 %vm312_vm1, %v6090_v51 }
  0xa2   : > { %4859 = vmatmul.mubr.msk.f32.gmra.mrb[6].mxu1 %vm312_vm1, %v5745_v34  ;;  %5083 = vmatmul.mubr.msk.f32.gmra.mrb[22].mxu0 %vm312_vm1, %v6101_v47 }
  0xa3   : > { %4861 = vmatprep.mubr.msk.f32.mxu1 %vm312_vm1, %v5751_v36  ;;  %5085 = vmatprep.mubr.msk.f32.mxu0 %vm312_vm1, %v6104_v43 }
  0xa6   : > { %4862 = vmatmul.mubr.msk.f32.gmra.mrb[8].mxu1 %vm312_vm1, %v5765_v38  ;;  %5086 = vmatmul.mubr.msk.f32.gmra.mrb[24].mxu0 %vm312_vm1, %v6115_v39 }
  0xa7   : > { %4864 = vmatprep.mubr.msk.f32.mxu1 %vm312_vm1, %v5771_v40  ;;  %5088 = vmatprep.mubr.msk.f32.mxu0 %vm312_vm1, %v6118_v35 }
  0xaa   : > { %4865 = vmatmul.mubr.msk.f32.gmra.mrb[10].mxu1 %vm312_vm1, %v5785_v42  ;;  %5089 = vmatmul.mubr.msk.f32.gmra.mrb[26].mxu0 %vm312_vm1, %v6129_v62 }
  0xab   : > { %4867 = vmatprep.mubr.msk.f32.mxu1 %vm312_vm1, %v5791_v44  ;;  %5091 = vmatprep.mubr.msk.f32.mxu0 %vm312_vm1, %v6184_v24 }
  0xae   : > { %4868 = vmatmul.mubr.msk.f32.gmra.mrb[12].mxu1 %vm312_vm1, %v5805_v46  ;;  %5092 = vmatmul.mubr.msk.f32.gmra.mrb[28].mxu0 %vm312_vm1, %v6195_v25 }
  0xaf   : > { %4870 = vmatprep.mubr.msk.f32.mxu1 %vm312_vm1, %v5811_v48  ;;  %5094 = vmatprep.mubr.msk.f32.mxu0 %vm312_vm1, %v4278_v33  ;;  %v6700_v33 = vld [vmem:[#allocation10_spill] sm:$0xff] }
  0xb2   : > { %4871 = vmatmul.mubr.msk.f32.gmra.mrb[14].mxu1 %vm312_vm1, %v5825_v50  ;;  %5095 = vmatmul.mubr.msk.f32.gmra.mrb[30].mxu0 %vm312_vm1, %v4279_v61  ;;  %v6701_v61 = vld [vmem:[#allocation23_spill] sm:$0xff] }
  0xb3   : > { %4873 = vmatprep.mubr.msk.f32.mxu1 %vm312_vm1, %v5831_v52  ;;  %5099 = vmatprep.mubr.msk.f32.mxu0 %vm312_vm1, %v5579_v8  ;;  %v6683_v8 = vld [vmem:[#allocation27_spill] sm:$0xff] }
  0xb6   : > { %4874 = vmatmul.mubr.msk.f32.gmra.mrb[16].mxu1 %vm312_vm1, %v5845_v54  ;;  %5100 = vmatmul.mubr.msk.f32.vlgmr.msra.gmra.mrb[0].mxu0 %vm312_vm1, %v5594_v11  ;;  %v6684_v11 = vld [vmem:[#allocation2_spill] sm:$0xff] }
  0xb7   : > { %5148 = vmatpush3.msk.msra.mxu0 %vm409_vm0, %v6030_v37  ;;  %4876 = vmatprep.mubr.msk.f32.mxu1 %vm312_vm1, %v5849_v56  ;;  %v6698_v37 = vld [vmem:[#allocation9_spill] sm:$0xff] }
  0xb8   : > { %5102 = vmatprep.mubr.msk.f32.mxu0 %vm312_vm1, %v5600_v12  ;;  %v6685_v12 = vld [vmem:[#allocation15_spill] sm:$0xff] }
  0xba   : > { %4877 = vmatmul.mubr.msk.f32.gmra.mrb[18].mxu1 %vm312_vm1, %v5860_v58  ;;  %5103 = vmatmul.mubr.msk.f32.gmra.mrb[2].mxu0 %vm312_vm1, %v5613_v13  ;;  %v6686_v13 = vld [vmem:[#allocation3_spill] sm:$0xff] }
  0xbb   : > { %4879 = vmatprep.mubr.msk.f32.mxu1 %vm312_vm1, %v5866_v60  ;;  %5105 = vmatprep.mubr.msk.f32.mxu0 %vm312_vm1, %v5616_v14  ;;  %v6687_v14 = vld [vmem:[#allocation16_spill] sm:$0xff] }
  0xbe   : > { %4880 = vmatmul.mubr.msk.f32.gmra.mrb[20].mxu1 %vm312_vm1, %v5884_v63  ;;  %5106 = vmatmul.mubr.msk.f32.gmra.mrb[4].mxu0 %vm312_vm1, %v5627_v15  ;;  %v6688_v15 = vld [vmem:[#allocation4_spill] sm:$0xff] }
  0xbf   : > { %4882 = vmatprep.mubr.msk.f32.mxu1 %vm312_vm1, %v5892_v2  ;;  %5108 = vmatprep.mubr.msk.f32.mxu0 %vm312_vm1, %v5630_v16  ;;  %v6689_v16 = vld [vmem:[#allocation17_spill] sm:$0xff] }
  0xc2   : > { %4883 = vmatmul.mubr.msk.f32.gmra.mrb[22].mxu1 %vm312_vm1, %v5908_v4  ;;  %5109 = vmatmul.mubr.msk.f32.gmra.mrb[6].mxu0 %vm312_vm1, %v5641_v17  ;;  %v6690_v17 = vld [vmem:[#allocation5_spill] sm:$0xff] }
  0xc3   : > { %4885 = vmatprep.mubr.msk.f32.mxu1 %vm312_vm1, %v5914_v6  ;;  %5111 = vmatprep.mubr.msk.f32.mxu0 %vm312_vm1, %v5644_v18  ;;  %v6691_v18 = vld [vmem:[#allocation18_spill] sm:$0xff] }
  0xc6   : > { %4886 = vmatmul.mubr.msk.f32.gmra.mrb[24].mxu1 %vm312_vm1, %v5928_v9  ;;  %5112 = vmatmul.mubr.msk.f32.gmra.mrb[8].mxu0 %vm312_vm1, %v5655_v19  ;;  %v6692_v19 = vld [vmem:[#allocation6_spill] sm:$0xff] }
  0xc7   : > { %4888 = vmatprep.mubr.msk.f32.mxu1 %vm312_vm1, %v5934_v55  ;;  %5114 = vmatprep.mubr.msk.f32.mxu0 %vm312_vm1, %v5658_v20  ;;  %v6693_v20 = vld [vmem:[#allocation19_spill] sm:$0xff] }
  0xca   : > { %4889 = vmatmul.mubr.msk.f32.gmra.mrb[26].mxu1 %vm312_vm1, %v5948_v53  ;;  %5115 = vmatmul.mubr.msk.f32.gmra.mrb[10].mxu0 %vm312_vm1, %v5669_v21  ;;  %v6694_v21 = vld [vmem:[#allocation7_spill] sm:$0xff] }
  0xcb   : > { %4891 = vmatprep.mubr.msk.f32.mxu1 %vm312_vm1, %v5954_v49  ;;  %5117 = vmatprep.mubr.msk.f32.mxu0 %vm312_vm1, %v5672_v22  ;;  %v6696_v22 = vld [vmem:[#allocation8_spill] sm:$0xff] }
  0xce   : > { %4892 = vmatmul.mubr.msk.f32.gmra.mrb[28].mxu1 %vm312_vm1, %v5968_v45  ;;  %5118 = vmatmul.mubr.msk.f32.gmra.mrb[12].mxu0 %vm312_vm1, %v5683_v23  ;;  %v6697_v23 = vld [vmem:[#allocation21_spill] sm:$0xff] }
  0xcf   : > { %4894 = vmatprep.mubr.msk.f32.mxu1 %vm312_vm1, %v5974_v41  ;;  %5120 = vmatprep.mubr.msk.f32.mxu0 %vm312_vm1, %v5700_v26 }
  0xd2   : > { %4895 = vmatmul.mubr.msk.f32.gmra.mrb[30].mxu1 %vm312_vm1, %v6683_v8  ;;  %5121 = vmatmul.mubr.msk.f32.gmra.mrb[14].mxu0 %vm312_vm1, %v6684_v11  ;;  %v6710_v8 = vld [vmem:[#allocation30_spill] sm:$0xff] }
  0xd3   : > { %4899 = vmatprep.mubr.msk.f32.mxu1 %vm312_vm1, %v6685_v12  ;;  %5123 = vmatprep.mubr.msk.f32.mxu0 %vm312_vm1, %v6686_v13  ;;  %v6702_v12 = vld [vmem:[#allocation11_spill] sm:$0xff] }
  0xd6   : > { %4900 = vmatmul.mubr.msk.f32.vlgmr.msra.gmra.mrb[0].mxu1 %vm312_vm1, %v6687_v14  ;;  %5124 = vmatmul.mubr.msk.f32.gmra.mrb[16].mxu0 %vm312_vm1, %v6688_v15  ;;  %v6703_v14 = vld [vmem:[#allocation24_spill] sm:$0xff] }
  0xd7   : > { %5198 = vmatpush3.msk.msra.mxu1 %vm409_vm0, %v5548_v1  ;;  %4902 = vmatprep.mubr.msk.f32.mxu1 %vm312_vm1, %v6689_v16  ;;  %v6695_v1 = vld [vmem:[#allocation20_spill] sm:$0xff] }
  0xd8   : > { %5126 = vmatprep.mubr.msk.f32.mxu0 %vm312_vm1, %v6690_v17  ;;  %v6704_v16 = vld [vmem:[#allocation12_spill] sm:$0xff] }
  0xda   : > { %4903 = vmatmul.mubr.msk.f32.gmra.mrb[2].mxu1 %vm312_vm1, %v6691_v18  ;;  %5127 = vmatmul.mubr.msk.f32.gmra.mrb[18].mxu0 %vm312_vm1, %v6692_v19  ;;  %v6705_v18 = vld [vmem:[#allocation25_spill] sm:$0xff] }
  0xdb   : > { %4905 = vmatprep.mubr.msk.f32.mxu1 %vm312_vm1, %v6693_v20  ;;  %5129 = vmatprep.mubr.msk.f32.mxu0 %vm312_vm1, %v6694_v21  ;;  %v6706_v20 = vld [vmem:[#allocation13_spill] sm:$0xff] }
  0xde   : > { %4906 = vmatmul.mubr.msk.f32.gmra.mrb[4].mxu1 %vm312_vm1, %v6695_v1  ;;  %5130 = vmatmul.mubr.msk.f32.gmra.mrb[20].mxu0 %vm312_vm1, %v6696_v22  ;;  %v6322_v1 = vld [vmem:[%s5570_s27 + $0x181] sm:$0xff] }
  0xdf   : > { %4908 = vmatprep.mubr.msk.f32.mxu1 %vm312_vm1, %v6697_v23  ;;  %5132 = vmatprep.mubr.msk.f32.mxu0 %vm312_vm1, %v6698_v37  ;;  %v6707_v23 = vld [vmem:[#allocation26_spill] sm:$0xff] }
  0xe2   : > { %4909 = vmatmul.mubr.msk.f32.gmra.mrb[6].mxu1 %vm312_vm1, %v6699_v3  ;;  %5133 = vmatmul.mubr.msk.f32.gmra.mrb[22].mxu0 %vm312_vm1, %v6700_v33  ;;  %v6708_v3 = vld [vmem:[#allocation14_spill] sm:$0xff] }
  0xe3   : > { %4911 = vmatprep.mubr.msk.f32.mxu1 %vm312_vm1, %v6701_v61  ;;  %5135 = vmatprep.mubr.msk.f32.mxu0 %vm312_vm1, %v6702_v12  ;;  %v6709_v61 = vld [vmem:[#allocation28_spill] sm:$0xff] }
  0xe6   : > { %4912 = vmatmul.mubr.msk.f32.gmra.mrb[8].mxu1 %vm312_vm1, %v6703_v14  ;;  %5136 = vmatmul.mubr.msk.f32.gmra.mrb[24].mxu0 %vm312_vm1, %v6704_v16  ;;  %v6333_v14 = vld [vmem:[%s5570_s27 + $0x189] sm:$0xff] }
  0xe7   : > { %4914 = vmatprep.mubr.msk.f32.mxu1 %vm312_vm1, %v6705_v18  ;;  %5138 = vmatprep.mubr.msk.f32.mxu0 %vm312_vm1, %v6706_v20  ;;  %v4344_v18 = vld [vmem:[%s5570_s27 + $0x199] sm:$0xff] }
  0xea   : > { %4915 = vmatmul.mubr.msk.f32.gmra.mrb[10].mxu1 %vm312_vm1, %v6707_v23  ;;  %5139 = vmatmul.mubr.msk.f32.gmra.mrb[26].mxu0 %vm312_vm1, %v6708_v3  ;;  %v4345_v23 = vld [vmem:[%s5570_s27 + $0x1a1] sm:$0xff]  ;;  %v6711_v3 = vld [vmem:[#allocation32_spill] sm:$0xff] }
  0xeb   : > { %4917 = vmatprep.mubr.msk.f32.mxu1 %vm312_vm1, %v6709_v61  ;;  %5141 = vmatprep.mubr.msk.f32.mxu0 %vm312_vm1, %v6322_v1 }
  0xee   : > { %4918 = vmatmul.mubr.msk.f32.gmra.mrb[12].mxu1 %vm312_vm1, %v6710_v8  ;;  %5142 = vmatmul.mubr.msk.f32.gmra.mrb[28].mxu0 %vm312_vm1, %v6333_v14 }
  0xef   : > { %4920 = vmatprep.mubr.msk.f32.mxu1 %vm312_vm1, %v6011_v59  ;;  %5144 = vmatprep.mubr.msk.f32.mxu0 %vm312_vm1, %v4344_v18 }
  0xf2   : > { %4921 = vmatmul.mubr.msk.f32.gmra.mrb[14].mxu1 %vm312_vm1, %v6711_v3  ;;  %5145 = vmatmul.mubr.msk.f32.gmra.mrb[30].mxu0 %vm312_vm1, %v4345_v23 }
  0xf3   : > { %4923 = vmatprep.mubr.msk.f32.mxu1 %vm312_vm1, %v6025_v29  ;;  %5149 = vmatprep.mubr.msk.f32.mxu0 %vm312_vm1, %v5703_v27  ;;  %v6713_v27 = vld [vmem:[#allocation29_spill] sm:$0xff] }
  0xf4   : > { %v4410_v29 = vld [vmem:[%s5570_s27 + $0x19a] sm:$0xff] }
  0xf6   : > { %4924 = vmatmul.mubr.msk.f32.gmra.mrb[16].mxu1 %vm312_vm1, %v6041_v31  ;;  %5150 = vmatmul.mubr.msk.f32.vlgmr.msra.gmra.mrb[0].mxu0 %vm312_vm1, %v5721_v30  ;;  %v6714_v30 = vld [vmem:[#allocation14_spill] sm:$0xff]  ;;  %v6715_v31 = vld [vmem:[#allocation31_spill] sm:$0xff] }
  0xf7   : > { %4926 = vmatprep.mubr.msk.f32.mxu1 %vm312_vm1, %v6046_v0  ;;  %5152 = vmatprep.mubr.msk.f32.mxu0 %vm312_vm1, %v5729_v32  ;;  %v4411_v32 = vld [vmem:[%s5570_s27 + $0x1a2] sm:$0xff] }
  0xfa   : > { %4927 = vmatmul.mubr.msk.f32.gmra.mrb[18].mxu1 %vm312_vm1, %v6059_v28  ;;  %5153 = vmatmul.mubr.msk.f32.gmra.mrb[2].mxu0 %vm312_vm1, %v5745_v34 }
  0xfb   : > { %4929 = vmatprep.mubr.msk.f32.mxu1 %vm312_vm1, %v6062_v5  ;;  %5155 = vmatprep.mubr.msk.f32.mxu0 %vm312_vm1, %v5751_v36 }
  0xfe   : > { %4930 = vmatmul.mubr.msk.f32.gmra.mrb[20].mxu1 %vm312_vm1, %v6073_v7  ;;  %5156 = vmatmul.mubr.msk.f32.gmra.mrb[4].mxu0 %vm312_vm1, %v5765_v38 }
  0xff   : > { %4932 = vmatprep.mubr.msk.f32.mxu1 %vm312_vm1, %v6076_v10  ;;  %5158 = vmatprep.mubr.msk.f32.mxu0 %vm312_vm1, %v5771_v40 }
 0x102   : > { %4933 = vmatmul.mubr.msk.f32.gmra.mrb[22].mxu1 %vm312_vm1, %v6087_v57  ;;  %5159 = vmatmul.mubr.msk.f32.gmra.mrb[6].mxu0 %vm312_vm1, %v5785_v42 }
 0x103   : > { %4935 = vmatprep.mubr.msk.f32.mxu1 %vm312_vm1, %v6090_v51  ;;  %5161 = vmatprep.mubr.msk.f32.mxu0 %vm312_vm1, %v5791_v44 }
 0x106   : > { %4936 = vmatmul.mubr.msk.f32.gmra.mrb[24].mxu1 %vm312_vm1, %v6101_v47  ;;  %5162 = vmatmul.mubr.msk.f32.gmra.mrb[8].mxu0 %vm312_vm1, %v5805_v46 }
 0x107   : > { %4938 = vmatprep.mubr.msk.f32.mxu1 %vm312_vm1, %v6104_v43  ;;  %5164 = vmatprep.mubr.msk.f32.mxu0 %vm312_vm1, %v5811_v48 }
 0x10a   : > { %4939 = vmatmul.mubr.msk.f32.gmra.mrb[26].mxu1 %vm312_vm1, %v6115_v39  ;;  %5165 = vmatmul.mubr.msk.f32.gmra.mrb[10].mxu0 %vm312_vm1, %v5825_v50 }
 0x10b   : > { %4941 = vmatprep.mubr.msk.f32.mxu1 %vm312_vm1, %v6118_v35  ;;  %5167 = vmatprep.mubr.msk.f32.mxu0 %vm312_vm1, %v5831_v52  ;;  %v6486_v52 = vld [vmem:[%s6605_s2] ss:$0 sm:$0xff] }
 0x10e   : > { %4942 = vmatmul.mubr.msk.f32.gmra.mrb[28].mxu1 %vm312_vm1, %v6129_v62  ;;  %5168 = vmatmul.mubr.msk.f32.gmra.mrb[12].mxu0 %vm312_vm1, %v5845_v54 }
 0x10f   : > { %4944 = vmatprep.mubr.msk.f32.mxu1 %vm312_vm1, %v6184_v24  ;;  %5170 = vmatprep.mubr.msk.f32.mxu0 %vm312_vm1, %v5849_v56 }
 0x112   : > { %4945 = vmatmul.mubr.msk.f32.gmra.mrb[30].mxu1 %vm312_vm1, %v6195_v25  ;;  %5171 = vmatmul.mubr.msk.f32.gmra.mrb[14].mxu0 %vm312_vm1, %v5860_v58 }
 0x113   : > { %4973 = vmatprep.mubr.msk.f32.mxu1 %vm312_vm1, %v5700_v26  ;;  %5173 = vmatprep.mubr.msk.f32.mxu0 %vm312_vm1, %v5866_v60  ;;  %v6712_v26 = vld [vmem:[#allocation27_spill] sm:$0xff] }
 0x116   : > { %4974 = vmatmul.mubr.msk.f32.vlgmr.msra.gmra.mrb[16].mxu1 %vm312_vm1, %v6684_v11  ;;  %5174 = vmatmul.mubr.msk.f32.gmra.mrb[16].mxu0 %vm312_vm1, %v5884_v63 }
 0x117   : > { %4976 = vmatprep.mubr.msk.f32.mxu1 %vm312_vm1, %v6686_v13  ;;  %5176 = vmatprep.mubr.msk.f32.mxu0 %vm312_vm1, %v5892_v2 }
 0x11a   : > { %4977 = vmatmul.mubr.msk.f32.gmra.mrb[18].mxu1 %vm312_vm1, %v6688_v15  ;;  %5177 = vmatmul.mubr.msk.f32.gmra.mrb[18].mxu0 %vm312_vm1, %v5908_v4 }
 0x11b   : > { %4979 = vmatprep.mubr.msk.f32.mxu1 %vm312_vm1, %v6690_v17  ;;  %5179 = vmatprep.mubr.msk.f32.mxu0 %vm312_vm1, %v5914_v6 }
 0x11e   : > { %4980 = vmatmul.mubr.msk.f32.gmra.mrb[20].mxu1 %vm312_vm1, %v6692_v19  ;;  %5180 = vmatmul.mubr.msk.f32.gmra.mrb[20].mxu0 %vm312_vm1, %v5928_v9 }
 0x11f   : > { %4982 = vmatprep.mubr.msk.f32.mxu1 %vm312_vm1, %v6694_v21  ;;  %5182 = vmatprep.mubr.msk.f32.mxu0 %vm312_vm1, %v5934_v55 }
 0x122   : > { %4983 = vmatmul.mubr.msk.f32.gmra.mrb[22].mxu1 %vm312_vm1, %v6696_v22  ;;  %5183 = vmatmul.mubr.msk.f32.gmra.mrb[22].mxu0 %vm312_vm1, %v5948_v53 }
 0x123   : > { %4985 = vmatprep.mubr.msk.f32.mxu1 %vm312_vm1, %v6698_v37  ;;  %5185 = vmatprep.mubr.msk.f32.mxu0 %vm312_vm1, %v5954_v49 }
 0x126   : > { %4986 = vmatmul.mubr.msk.f32.gmra.mrb[24].mxu1 %vm312_vm1, %v6700_v33  ;;  %5186 = vmatmul.mubr.msk.f32.gmra.mrb[24].mxu0 %vm312_vm1, %v5968_v45 }
 0x127   : > { %4988 = vmatprep.mubr.msk.f32.mxu1 %vm312_vm1, %v6702_v12  ;;  %5188 = vmatprep.mubr.msk.f32.mxu0 %vm312_vm1, %v5974_v41 }
 0x12a   : > { %4989 = vmatmul.mubr.msk.f32.gmra.mrb[26].mxu1 %vm312_vm1, %v6704_v16  ;;  %5189 = vmatmul.mubr.msk.f32.gmra.mrb[26].mxu0 %vm312_vm1, %v6712_v26 }
 0x12b   : > { %4991 = vmatprep.mubr.msk.f32.mxu1 %vm312_vm1, %v6706_v20  ;;  %5191 = vmatprep.mubr.msk.f32.mxu0 %vm312_vm1, %v6713_v27 }
 0x12e   : > { %4992 = vmatmul.mubr.msk.f32.gmra.mrb[28].mxu1 %vm312_vm1, %v6714_v30  ;;  %5192 = vmatmul.mubr.msk.f32.gmra.mrb[28].mxu0 %vm312_vm1, %v6715_v31 }
 0x12f   : > { %4994 = vmatprep.mubr.msk.f32.mxu1 %vm312_vm1, %v6322_v1  ;;  %5194 = vmatprep.mubr.msk.f32.mxu0 %vm312_vm1, %v4410_v29 }
 0x132   : > { %4995 = vmatmul.mubr.msk.f32.gmra.mrb[30].mxu1 %vm312_vm1, %v6333_v14  ;;  %5195 = vmatmul.mubr.msk.f32.gmra.mrb[30].mxu0 %vm312_vm1, %v4411_v32 }
 0x1a9   : > { %v4901_v34 = vpop.f32.mrb[0].mxu1 }
 0x1aa   : > { %v1554_v35 = vpop.f32.mrb[1].mxu1 }
 0x1ad   : > { %v4904_v36 = vpop.f32.mrb[2].mxu1 }
 0x1ae   : > { %v1564_v38 = vpop.f32.mrb[3].mxu1 }
 0x1b1   : > { %v4907_v39 = vpop.f32.mrb[4].mxu1 }
 0x1b2   : > { %v1574_v40 = vpop.f32.mrb[5].mxu1 }
 0x1b5   : > { %v4910_v41 = vpop.f32.mrb[6].mxu1 }
 0x1b6   : > { %v1584_v42 = vpop.f32.mrb[7].mxu1 }
 0x1b9   : > { %v4913_v43 = vpop.f32.mrb[8].mxu1 }
 0x1ba   : > { %v1594_v44 = vpop.f32.mrb[9].mxu1 }
 0x1bd   : > { %v4916_v45 = vpop.f32.mrb[10].mxu1 }
 0x1be   : > { %v1604_v46 = vpop.f32.mrb[11].mxu1 }
 0x1c1   : > { %v6475_v47 = vpop.f32.mrb[12].mxu1 }
 0x1c2   : > { %v6477_v48 = vpop.f32.mrb[13].mxu1 }
 0x1c5   : > { %v6479_v49 = vpop.f32.mrb[14].mxu1 }
 0x1c6   : > { %v6481_v50 = vpop.f32.mrb[15].mxu1 }
 0x1c9   : > { %v5151_v51 = vpop.f32.mrb[0].mxu0 }
 0x1ca   : > { %v5199_v53 = vadd.f32 %v5151_v51, %v4901_v34  ;;  %v3507_v54 = vpop.f32.mrb[1].mxu0 }
 0x1cb   : > { %v5200_v56 = vadd.f32 %v3507_v54, %v1554_v35 }
 0x1cc   : > { %v3706_v58 = vadd.f32 %v5199_v53, %v6486_v52 }
 0x1cd   : > { %v3705_v59 = vadd.f32 %v5200_v56, %v6486_v52  ;;  %v5154_v60 = vpop.f32.mrb[2].mxu0 }
 0x1ce   : > { %v3738_v62 = vmax.f32 %v3706_v58, 0.0  ;;  %v5201_v63 = vadd.f32 %v5154_v60, %v4904_v36  ;;  %v3517_v0 = vpop.f32.mrb[3].mxu0 }
 0x1cf   : > { %v3737_v2 = vmax.f32 %v3705_v59, 0.0  ;;  %v5202_v4 = vadd.f32 %v3517_v0, %v1564_v38 }
 0x1d0   : > { %3771 = vst.msk [vmem:[%s6493_s20 + $0x8] sm:$0xff] %vm3769_vm2, %v3738_v62  ;;  %v3708_v5 = vadd.f32 %v5201_v63, %v6486_v52 }
 0x1d1   : > { %3770 = vst.msk [vmem:[%s6493_s20] sm:$0xff] %vm3769_vm2, %v3737_v2  ;;  %v3707_v6 = vadd.f32 %v5202_v4, %v6486_v52  ;;  %v5157_v7 = vpop.f32.mrb[4].mxu0 }
 0x1d2   : > { %v3740_v9 = vmax.f32 %v3708_v5, 0.0  ;;  %v5203_v10 = vadd.f32 %v5157_v7, %v4907_v39  ;;  %v3527_v55 = vpop.f32.mrb[5].mxu0 }
 0x1d3   : > { %v3739_v57 = vmax.f32 %v3707_v6, 0.0  ;;  %v5204_v28 = vadd.f32 %v3527_v55, %v1574_v40 }
 0x1d4   : > { %3773 = vst.msk [vmem:[%s6493_s20 + $0x18] sm:$0xff] %vm3769_vm2, %v3740_v9  ;;  %v3710_v24 = vadd.f32 %v5203_v10, %v6486_v52 }
 0x1d5   : > { %3772 = vst.msk [vmem:[%s6493_s20 + $0x10] sm:$0xff] %vm3769_vm2, %v3739_v57  ;;  %v3709_v25 = vadd.f32 %v5204_v28, %v6486_v52  ;;  %v5160_v8 = vpop.f32.mrb[6].mxu0 }
 0x1d6   : > { %v3742_v11 = vmax.f32 %v3710_v24, 0.0  ;;  %v5205_v13 = vadd.f32 %v5160_v8, %v4910_v41  ;;  %v3537_v15 = vpop.f32.mrb[7].mxu0 }
 0x1d7   : > { %v3741_v17 = vmax.f32 %v3709_v25, 0.0  ;;  %v5206_v19 = vadd.f32 %v3537_v15, %v1584_v42 }
 0x1d8   : > { %3775 = vst.msk [vmem:[%s6493_s20 + $0x28] sm:$0xff] %vm3769_vm2, %v3742_v11  ;;  %v3712_v21 = vadd.f32 %v5205_v13, %v6486_v52 }
 0x1d9   : > { %3774 = vst.msk [vmem:[%s6493_s20 + $0x20] sm:$0xff] %vm3769_vm2, %v3741_v17  ;;  %v3711_v22 = vadd.f32 %v5206_v19, %v6486_v52  ;;  %v5163_v37 = vpop.f32.mrb[8].mxu0 }
 0x1da   : > { %v3744_v33 = vmax.f32 %v3712_v21, 0.0  ;;  %v5207_v12 = vadd.f32 %v5163_v37, %v4913_v43  ;;  %v3547_v16 = vpop.f32.mrb[9].mxu0 }
 0x1db   : > { %v3743_v20 = vmax.f32 %v3711_v22, 0.0  ;;  %v5208_v1 = vadd.f32 %v3547_v16, %v1594_v44 }
 0x1dc   : > { %3777 = vst.msk [vmem:[%s6493_s20 + $0x38] sm:$0xff] %vm3769_vm2, %v3744_v33  ;;  %v3714_v3 = vadd.f32 %v5207_v12, %v6486_v52 }
 0x1dd   : > { %3776 = vst.msk [vmem:[%s6493_s20 + $0x30] sm:$0xff] %vm3769_vm2, %v3743_v20  ;;  %v3713_v61 = vadd.f32 %v5208_v1, %v6486_v52  ;;  %v5166_v14 = vpop.f32.mrb[10].mxu0 }
 0x1de   : > { %v3746_v18 = vmax.f32 %v3714_v3, 0.0  ;;  %v5209_v23 = vadd.f32 %v5166_v14, %v4916_v45  ;;  %v3557_v26 = vpop.f32.mrb[11].mxu0 }
 0x1df   : > { %v3745_v27 = vmax.f32 %v3713_v61, 0.0  ;;  %v5210_v29 = vadd.f32 %v3557_v26, %v1604_v46 }
 0x1e0   : > { %3779 = vst.msk [vmem:[%s6493_s20 + $0x48] sm:$0xff] %vm3769_vm2, %v3746_v18  ;;  %v3716_v30 = vadd.f32 %v5209_v23, %v6486_v52 }
 0x1e1   : > { %3778 = vst.msk [vmem:[%s6493_s20 + $0x40] sm:$0xff] %vm3769_vm2, %v3745_v27  ;;  %v3715_v31 = vadd.f32 %v5210_v29, %v6486_v52  ;;  %v5169_v32 = vpop.f32.mrb[12].mxu0 }
 0x1e2   : > { %v3748_v34 = vmax.f32 %v3716_v30, 0.0  ;;  %v5211_v35 = vadd.f32 %v5169_v32, %v6475_v47  ;;  %v3567_v36 = vpop.f32.mrb[13].mxu0 }
 0x1e3   : > { %v3747_v38 = vmax.f32 %v3715_v31, 0.0  ;;  %v5212_v39 = vadd.f32 %v3567_v36, %v6477_v48 }
 0x1e4   : > { %3781 = vst.msk [vmem:[%s6493_s20 + $0x58] sm:$0xff] %vm3769_vm2, %v3748_v34  ;;  %v3718_v40 = vadd.f32 %v5211_v35, %v6486_v52 }
 0x1e5   : > { %3780 = vst.msk [vmem:[%s6493_s20 + $0x50] sm:$0xff] %vm3769_vm2, %v3747_v38  ;;  %v3717_v41 = vadd.f32 %v5212_v39, %v6486_v52  ;;  %v5172_v42 = vpop.f32.mrb[14].mxu0 }
 0x1e6   : > { %v3750_v43 = vmax.f32 %v3718_v40, 0.0  ;;  %v5213_v44 = vadd.f32 %v5172_v42, %v6479_v49  ;;  %v3577_v45 = vpop.f32.mrb[15].mxu0 }
 0x1e7   : > { %v3749_v46 = vmax.f32 %v3717_v41, 0.0  ;;  %v5214_v47 = vadd.f32 %v3577_v45, %v6481_v50 }
 0x1e8   : > { %3783 = vst.msk [vmem:[%s6493_s20 + $0x68] sm:$0xff] %vm3769_vm2, %v3750_v43  ;;  %v3720_v48 = vadd.f32 %v5213_v44, %v6486_v52 }
 0x1e9   : > { %3782 = vst.msk [vmem:[%s6493_s20 + $0x60] sm:$0xff] %vm3769_vm2, %v3749_v46  ;;  %v3719_v51 = vadd.f32 %v5214_v47, %v6486_v52  ;;  %v4975_v53 = vpop.f32.mrb[16].mxu1  ;;  %v5175_v54 = vpop.f32.mrb[16].mxu0 }
 0x1ea   : > { %v3752_v56 = vmax.f32 %v3720_v48, 0.0  ;;  %v5215_v58 = vadd.f32 %v5175_v54, %v4975_v53  ;;  %v2024_v59 = vpop.f32.mrb[17].mxu1  ;;  %v3587_v49 = vpop.f32.mrb[17].mxu0 }
 0x1eb   : > { %v3751_v60 = vmax.f32 %v3719_v51, 0.0  ;;  %v5216_v62 = vadd.f32 %v3587_v49, %v2024_v59 }
 0x1ec   : > { %3785 = vst.msk [vmem:[%s6493_s20 + $0x78] sm:$0xff] %vm3769_vm2, %v3752_v56  ;;  %v3722_v50 = vadd.f32 %v5215_v58, %v6486_v52 }
 0x1ed   : > { %3784 = vst.msk [vmem:[%s6493_s20 + $0x70] sm:$0xff] %vm3769_vm2, %v3751_v60  ;;  %v3721_v63 = vadd.f32 %v5216_v62, %v6486_v52  ;;  %v4978_v0 = vpop.f32.mrb[18].mxu1  ;;  %v5178_v2 = vpop.f32.mrb[18].mxu0 }
 0x1ee   : > { %v3754_v4 = vmax.f32 %v3722_v50, 0.0  ;;  %v5217_v5 = vadd.f32 %v5178_v2, %v4978_v0  ;;  %v2034_v6 = vpop.f32.mrb[19].mxu1  ;;  %v3597_v7 = vpop.f32.mrb[19].mxu0 }
 0x1ef   : > { %v3753_v9 = vmax.f32 %v3721_v63, 0.0  ;;  %v5218_v10 = vadd.f32 %v3597_v7, %v2034_v6 }
 0x1f0   : > { %3787 = vst.msk [vmem:[%s6493_s20 + $0x88] sm:$0xff] %vm3769_vm2, %v3754_v4  ;;  %v3724_v55 = vadd.f32 %v5217_v5, %v6486_v52 }
 0x1f1   : > { %3786 = vst.msk [vmem:[%s6493_s20 + $0x80] sm:$0xff] %vm3769_vm2, %v3753_v9  ;;  %v3723_v57 = vadd.f32 %v5218_v10, %v6486_v52  ;;  %v4981_v28 = vpop.f32.mrb[20].mxu1  ;;  %v5181_v24 = vpop.f32.mrb[20].mxu0 }
 0x1f2   : > { %v3756_v25 = vmax.f32 %v3724_v55, 0.0  ;;  %v5219_v8 = vadd.f32 %v5181_v24, %v4981_v28  ;;  %v2044_v11 = vpop.f32.mrb[21].mxu1  ;;  %v3607_v13 = vpop.f32.mrb[21].mxu0 }
 0x1f3   : > { %v3755_v15 = vmax.f32 %v3723_v57, 0.0  ;;  %v5220_v17 = vadd.f32 %v3607_v13, %v2044_v11 }
 0x1f4   : > { %3789 = vst.msk [vmem:[%s6493_s20 + $0x98] sm:$0xff] %vm3769_vm2, %v3756_v25  ;;  %v3726_v19 = vadd.f32 %v5219_v8, %v6486_v52 }
 0x1f5   : > { %3788 = vst.msk [vmem:[%s6493_s20 + $0x90] sm:$0xff] %vm3769_vm2, %v3755_v15  ;;  %v3725_v21 = vadd.f32 %v5220_v17, %v6486_v52  ;;  %v4984_v22 = vpop.f32.mrb[22].mxu1  ;;  %v5184_v37 = vpop.f32.mrb[22].mxu0 }
 0x1f6   : > { %v3758_v33 = vmax.f32 %v3726_v19, 0.0  ;;  %v5221_v12 = vadd.f32 %v5184_v37, %v4984_v22  ;;  %v2054_v16 = vpop.f32.mrb[23].mxu1  ;;  %v3617_v20 = vpop.f32.mrb[23].mxu0 }
 0x1f7   : > { %v3757_v1 = vmax.f32 %v3725_v21, 0.0  ;;  %v5222_v3 = vadd.f32 %v3617_v20, %v2054_v16 }
 0x1f8   : > { %3791 = vst.msk [vmem:[%s6493_s20 + $0xa8] sm:$0xff] %vm3769_vm2, %v3758_v33  ;;  %v3728_v61 = vadd.f32 %v5221_v12, %v6486_v52 }
 0x1f9   : > { %3790 = vst.msk [vmem:[%s6493_s20 + $0xa0] sm:$0xff] %vm3769_vm2, %v3757_v1  ;;  %v3727_v14 = vadd.f32 %v5222_v3, %v6486_v52  ;;  %v4987_v18 = vpop.f32.mrb[24].mxu1  ;;  %v5187_v23 = vpop.f32.mrb[24].mxu0 }
 0x1fa   : > { %v3760_v26 = vmax.f32 %v3728_v61, 0.0  ;;  %v5223_v27 = vadd.f32 %v5187_v23, %v4987_v18  ;;  %v2064_v29 = vpop.f32.mrb[25].mxu1  ;;  %v3627_v30 = vpop.f32.mrb[25].mxu0 }
 0x1fb   : > { %v3759_v31 = vmax.f32 %v3727_v14, 0.0  ;;  %v5224_v32 = vadd.f32 %v3627_v30, %v2064_v29 }
 0x1fc   : > { %3793 = vst.msk [vmem:[%s6493_s20 + $0xb8] sm:$0xff] %vm3769_vm2, %v3760_v26  ;;  %v3730_v34 = vadd.f32 %v5223_v27, %v6486_v52 }
 0x1fd   : > { %3792 = vst.msk [vmem:[%s6493_s20 + $0xb0] sm:$0xff] %vm3769_vm2, %v3759_v31  ;;  %v3729_v35 = vadd.f32 %v5224_v32, %v6486_v52  ;;  %v4990_v36 = vpop.f32.mrb[26].mxu1  ;;  %v5190_v38 = vpop.f32.mrb[26].mxu0 }
 0x1fe   : > { %v3762_v39 = vmax.f32 %v3730_v34, 0.0  ;;  %v5225_v40 = vadd.f32 %v5190_v38, %v4990_v36  ;;  %v2074_v41 = vpop.f32.mrb[27].mxu1  ;;  %v3637_v42 = vpop.f32.mrb[27].mxu0 }
 0x1ff   : > { %v3761_v43 = vmax.f32 %v3729_v35, 0.0  ;;  %v5226_v44 = vadd.f32 %v3637_v42, %v2074_v41 }
 0x200   : > { %3795 = vst.msk [vmem:[%s6493_s20 + $0xc8] sm:$0xff] %vm3769_vm2, %v3762_v39  ;;  %v3732_v45 = vadd.f32 %v5225_v40, %v6486_v52 }
 0x201   : > { %3794 = vst.msk [vmem:[%s6493_s20 + $0xc0] sm:$0xff] %vm3769_vm2, %v3761_v43  ;;  %v3731_v46 = vadd.f32 %v5226_v44, %v6486_v52  ;;  %v4993_v47 = vpop.f32.mrb[28].mxu1  ;;  %v5193_v48 = vpop.f32.mrb[28].mxu0 }
 0x202   : > { %v3764_v51 = vmax.f32 %v3732_v45, 0.0  ;;  %v5227_v53 = vadd.f32 %v5193_v48, %v4993_v47  ;;  %v2084_v54 = vpop.f32.mrb[29].mxu1  ;;  %v3647_v56 = vpop.f32.mrb[29].mxu0 }
 0x203   : > { %v3763_v58 = vmax.f32 %v3731_v46, 0.0  ;;  %v5228_v59 = vadd.f32 %v3647_v56, %v2084_v54 }
 0x204   : > { %3797 = vst.msk [vmem:[%s6493_s20 + $0xd8] sm:$0xff] %vm3769_vm2, %v3764_v51  ;;  %v3734_v49 = vadd.f32 %v5227_v53, %v6486_v52 }
 0x205   : > { %3796 = vst.msk [vmem:[%s6493_s20 + $0xd0] sm:$0xff] %vm3769_vm2, %v3763_v58  ;;  %v3733_v60 = vadd.f32 %v5228_v59, %v6486_v52  ;;  %v4996_v62 = vpop.f32.mrb[30].mxu1  ;;  %v5196_v50 = vpop.f32.mrb[30].mxu0 }
 0x206   : > { %v3766_v63 = vmax.f32 %v3734_v49, 0.0  ;;  %v5229_v0 = vadd.f32 %v5196_v50, %v4996_v62  ;;  %v2094_v2 = vpop.f32.mrb[31].mxu1  ;;  %v3657_v4 = vpop.f32.mrb[31].mxu0 }
 0x207   : > { %v3765_v5 = vmax.f32 %v3733_v60, 0.0  ;;  %v5230_v6 = vadd.f32 %v3657_v4, %v2094_v2 }
 0x208   : > { %3799 = vst.msk [vmem:[%s6493_s20 + $0xe8] sm:$0xff] %vm3769_vm2, %v3766_v63  ;;  %v3736_v7 = vadd.f32 %v5229_v0, %v6486_v52 }
 0x209   : > { %3798 = vst.msk [vmem:[%s6493_s20 + $0xe0] sm:$0xff] %vm3769_vm2, %v3765_v5  ;;  %v3735_v9 = vadd.f32 %v5230_v6, %v6486_v52 }
 0x20a   : > { %v3768_v10 = vmax.f32 %v3736_v7, 0.0 }
 0x20b   : > { %v3767_v55 = vmax.f32 %v3735_v9, 0.0 }
 0x20c   : > { %3801 = vst.msk [vmem:[%s6493_s20 + $0xf8] sm:$0xff] %vm3769_vm2, %v3768_v10 }
 0x20d   : > { %3800 = vst.msk [vmem:[%s6493_s20 + $0xf0] sm:$0xff] %vm3769_vm2, %v3767_v55 }
 0x20e PF: > { %s13_s14 = sadd.s32 1, %s5502_s14   ;;  %s6716_s12 = smov %s5498_s13 }
 0x20f   : > { %p10_p5 = scmp.ge.s32.totalorder %s13_s14, 4   ;;  %s6717_s13 = smov %s6719_s15 }
 0x211   :  { %12 = sbr.rel (!%p10_p5) target bundleno = 2 (0x2), region = 79 }

</bundles_post_ra>
